<compile_context>
chip_gen: v6e
topology: v6e:2x2x1
jax: 0.10.0
libtpu: 0.0.40
codegen_flags: <defaults>
</compile_context>

<pallas_src>
import jax
import jax.numpy as jnp
from jax.experimental import pallas as pl
from jax.experimental.pallas import tpu as pltpu


def _se_gate_kernel(s_ref, w_ref, b_ref, x_ref, o_ref):
    # s_ref : (1, Cin)          w_ref : (tile_cout, Cin)
    # b_ref : (tile_cout, 1)    x_ref : (tile_cout, HW)    o_ref : (tile_cout, HW)
    s = s_ref[...].astype(jnp.float32)
    w = w_ref[...].astype(jnp.float32)
    b = b_ref[...].astype(jnp.float32)
    # 1x1-conv on a 1x1 map == per-channel dot(w_row, s).  K=36 is far too small
    # for the MXU, so do it as a VPU multiply + XLU lane-reduction instead.
    lin = jnp.sum(w * s, axis=1, keepdims=True) + b        # (tile_cout, 1)
    gate = jax.nn.sigmoid(lin)                              # EUP, (tile_cout, 1)
    o_ref[...] = (x_ref[...] * gate.astype(x_ref.dtype)).astype(o_ref.dtype)


def _pick_cout_tile(cout, target=432):
    """Largest multiple-of-8 divisor of cout <= target, preferring an even grid.

    Even grid keeps both v7x TensorCores busy with dimension_semantics=("parallel",);
    the large target keeps the grid at 2-3 steps so fixed per-step overhead
    (~0.35 us) stays well below the DMA time.
    """
    divisors = [t for t in range(8, min(cout, target) + 1, 8) if cout % t == 0]
    if not divisors:
        return cout
    even = [t for t in divisors if (cout // t) % 2 == 0]
    return max(even) if even else max(divisors)


def se_gate(s, w, b, x_flat, *, donate_x=False):
    cout, hw = x_flat.shape
    cin = s.shape[1]
    tile = _pick_cout_tile(cout)
    grid = (cout // tile,)

    itemsize = jnp.dtype(x_flat.dtype).itemsize
    cost = pl.CostEstimate(
        flops=2 * cout * cin + cout * hw,
        transcendentals=cout,
        bytes_accessed=(cin * 4 + cout * cin * 4 + cout * 4
                        + 2 * cout * hw * itemsize),
    )

    kwargs = {}
    if donate_x:
        # x_flat (input index 3) aliases the output buffer; safe only with the
        # current 1:1 tile index_map AND if the caller no longer needs x312.
        kwargs["input_output_aliases"] = {3: 0}

    return pl.pallas_call(
        _se_gate_kernel,
        out_shape=jax.ShapeDtypeStruct((cout, hw), x_flat.dtype),
        grid=grid,
        in_specs=[
            pl.BlockSpec((1, cin), lambda i: (0, 0)),       # s: resident
            pl.BlockSpec((tile, cin), lambda i: (i, 0)),    # w: tiled over Cout
            pl.BlockSpec((tile, 1), lambda i: (i, 0)),      # b: tiled over Cout
            pl.BlockSpec((tile, hw), lambda i: (i, 0)),     # x: tiled over Cout
        ],
        out_specs=pl.BlockSpec((tile, hw), lambda i: (i, 0)),
        compiler_params=pltpu.CompilerParams(
            dimension_semantics=("parallel",),
        ),
        cost_estimate=cost,
        **kwargs,
    )(s, w, b, x_flat)


def module_forward(x315, x312, weight, bias):
    """Matches M.forward(x315, x312) with NCHW PyTorch conventions.

    x315   : (1, Cin, 1, 1)
    x312   : (1, Cout, H, W)
    weight : (Cout, Cin, 1, 1)
    bias   : (Cout,)
    returns: (1, Cout, H, W)
    """
    n, cout, h, w_sp = x312.shape
    cin = x315.shape[1]
    assert n == 1, "this SE-gate kernel assumes batch size 1 (as in the module)"

    # glue: free reshapes only (no transposes)
    s = x315.reshape(n, cin)                 # (1, Cin)
    w = weight.reshape(cout, cin)            # (Cout, Cin)
    b = bias.reshape(cout, 1)                # (Cout, 1)
    x_flat = x312.reshape(cout, h * w_sp)    # (Cout, HW) -- contiguous view

    out_flat = se_gate(s, w, b, x_flat)      # (Cout, HW)
    return out_flat.reshape(n, cout, h, w_sp)


if __name__ == "__main__":
    key = jax.random.PRNGKey(0)
    k1, k2, k3, k4 = jax.random.split(key, 4)

    CIN, COUT, H, W = 36, 864, 14, 14

    # deterministic synthetic inputs (same shapes as the PyTorch module)
    x312 = jax.random.normal(k1, (1, COUT, H, W), dtype=jnp.float32)
    x315 = jax.random.normal(k2, (1, CIN, 1, 1), dtype=jnp.float32)

    # deterministic Conv2d(36, 864, 1) parameters, PyTorch-style uniform init
    bound = 1.0 / jnp.sqrt(jnp.float32(CIN))
    weight = jax.random.uniform(k3, (COUT, CIN, 1, 1), jnp.float32, -bound, bound)
    bias = jax.random.uniform(k4, (COUT,), jnp.float32, -bound, bound)

    # pure-JAX reference (computed first, before any potential buffer aliasing)
    gate_ref = jax.nn.sigmoid(
        jnp.einsum("oi,ni->no", weight.reshape(COUT, CIN), x315.reshape(1, CIN)) + bias
    ).reshape(1, COUT, 1, 1)
    ref = gate_ref * x312
    ref = jax.block_until_ready(ref)

    out = module_forward(x315, x312, weight, bias)
    out = jax.block_until_ready(out)

    assert out.shape == (1, COUT, H, W)
    assert jnp.allclose(out, ref, atol=1e-5, rtol=1e-5)

    print("KERNEL_OK")
</pallas_src>

<mosaic_0001>
module attributes {stable_mosaic.version = 11 : i64} {
  func.func @_se_gate_kernel(%arg0: i32, %arg1: memref<1x36xf32, #tpu.memory_space<vmem>>, %arg2: memref<432x36xf32, #tpu.memory_space<vmem>>, %arg3: memref<432x1xf32, #tpu.memory_space<vmem>>, %arg4: memref<432x196xf32, #tpu.memory_space<vmem>>, %arg5: memref<432x196xf32, #tpu.memory_space<vmem>>) attributes {dimension_semantics = [#tpu.dimension_semantics<parallel>], iteration_bounds = array<i64: 2>, scalar_prefetch = 0 : i64, scratch_operands = 0 : i64, tpu.core_type = #tpu.core_type<tc>, window_params = [{pipeline_mode = #tpu.pipeline_mode<synchronous>, transform_indices = @transform_0, window_bounds = array<i64: 1, 36>}, {transform_indices = @transform_1, window_bounds = array<i64: 432, 36>}, {transform_indices = @transform_2, window_bounds = array<i64: 432, 1>}, {transform_indices = @transform_3, window_bounds = array<i64: 432, 196>}, {transform_indices = @transform_4, window_bounds = array<i64: 432, 196>}]} {
    %c0 = arith.constant 0 : index
    %c0_0 = arith.constant 0 : index
    %0 = vector.load %arg1[%c0, %c0_0] : memref<1x36xf32, #tpu.memory_space<vmem>>, vector<1x36xf32>
    %c0_1 = arith.constant 0 : index
    %c0_2 = arith.constant 0 : index
    %1 = vector.load %arg2[%c0_1, %c0_2] : memref<432x36xf32, #tpu.memory_space<vmem>>, vector<432x36xf32>
    %c0_3 = arith.constant 0 : index
    %c0_4 = arith.constant 0 : index
    %2 = vector.load %arg3[%c0_3, %c0_4] : memref<432x1xf32, #tpu.memory_space<vmem>>, vector<432x1xf32>
    %3 = vector.broadcast %0 : vector<1x36xf32> to vector<432x36xf32>
    %4 = arith.mulf %1, %3 : vector<432x36xf32>
    %cst = arith.constant dense<0.000000e+00> : vector<432xf32>
    %5 = vector.multi_reduction <add>, %4, %cst [1] : vector<432x36xf32> to vector<432xf32>
    %6 = vector.shape_cast %5 : vector<432xf32> to vector<432x1xf32>
    %7 = arith.addf %6, %2 : vector<432x1xf32>
    %8 = arith.negf %7 : vector<432x1xf32>
    %9 = math.exp %8 : vector<432x1xf32>
    %cst_5 = arith.constant 1.000000e+00 : f32
    %10 = vector.broadcast %cst_5 : f32 to vector<432x1xf32>
    %11 = arith.addf %10, %9 : vector<432x1xf32>
    %12 = arith.divf %10, %11 : vector<432x1xf32>
    %c0_6 = arith.constant 0 : index
    %c0_7 = arith.constant 0 : index
    %13 = vector.load %arg4[%c0_6, %c0_7] : memref<432x196xf32, #tpu.memory_space<vmem>>, vector<432x196xf32>
    %14 = vector.broadcast %12 : vector<432x1xf32> to vector<432x196xf32>
    %15 = arith.mulf %13, %14 : vector<432x196xf32>
    %c0_8 = arith.constant 0 : index
    %c0_9 = arith.constant 0 : index
    %16 = vector.load %arg5[%c0_8, %c0_9] : memref<432x196xf32, #tpu.memory_space<vmem>>, vector<432x196xf32>
    tpu.vector_store %arg5[%c0_8, %c0_9], %15 {strides = array<i32>} : memref<432x196xf32, #tpu.memory_space<vmem>>, vector<432x196xf32>,
    return
  }
  func.func @transform_0(%arg0: i32) -> (i32, i32) {
    %c0_i32 = arith.constant 0 : i32
    %c0_i32_0 = arith.constant 0 : i32
    %c0_i32_1 = arith.constant 0 : i32
    return %c0_i32, %c0_i32_0 : i32, i32
  }
  func.func @transform_1(%arg0: i32) -> (i32, i32) {
    %c0_i32 = arith.constant 0 : i32
    %c0_i32_0 = arith.constant 0 : i32
    return %arg0, %c0_i32 : i32, i32
  }
  func.func @transform_2(%arg0: i32) -> (i32, i32) {
    %c0_i32 = arith.constant 0 : i32
    %c0_i32_0 = arith.constant 0 : i32
    return %arg0, %c0_i32 : i32, i32
  }
  func.func @transform_3(%arg0: i32) -> (i32, i32) {
    %c0_i32 = arith.constant 0 : i32
    %c0_i32_0 = arith.constant 0 : i32
    return %arg0, %c0_i32 : i32, i32
  }
  func.func @transform_4(%arg0: i32) -> (i32, i32) {
    %c0_i32 = arith.constant 0 : i32
    %c0_i32_0 = arith.constant 0 : i32
    return %arg0, %c0_i32 : i32, i32
  }
}

</mosaic_0001>

<bundles_post_ra>
// kernel: tpu_custom_call.1
= control target key start
LH: loop header
LB: loop body
LE: loop exit
PB: predicated region body
PF: predicated region fallthrough
CT: control target
= control target key end

     0   :  { %s1968_s15 = smov 0   ;;  %s2567_s0 = inlined_call_operand.vmem [shape: f32[1,36], index: 0, kind: input, shape index: {}]   ;;  %s2568_s1 = inlined_call_operand.vmem [shape: f32[864,36], index: 1, kind: input, shape index: {}]   ;;  %s2569_s2 = inlined_call_operand.vmem [shape: f32[864,1], index: 2, kind: input, shape index: {}]   ;;  %s2570_s3 = inlined_call_operand.vmem [shape: f32[864,196], index: 3, kind: input, shape index: {}]   ;;  %s2571_s4 = inlined_call_operand.vmem [shape: f32[864,196], index: 4, kind: output, shape index: {}]  }
   0x1 LB: > { %s1637_s16 = sadd.s32 4294967295, %s1940_s15   ;;  %p1641_p0 = scmp.ge.s32.totalorder %s1940_s15, 1  ;;  %s1940_s15 = sphi %s1968_s15, %s14_s15  }
   0x2   : > { %p186_p1 = scmp.lt.s32.totalorder %s1940_s15, 3 }
   0x4   : > { %p187_p2 = pnand %p1641_p0, %p186_p1 }
   0x5   : > { %s224_s17 = smul.u32 (!%p187_p2), 54, %s1637_s16 }
   0x6   : > { %190 = sbr.rel (%p187_p2) target bundleno = 437 (0x1b5), region = 36 }
   0x7   : > { %p225_p3 = scmp.lt.s32.totalorder (!%p187_p2), %s224_s17, 107 }
   0xb   : > { %s2573_s17 = smov (!%p225_p3, %s224_s17), 107  ;;  %v1982_v0 = vld [vmem:[%s2567_s0] ss:$0 sm:$0xff]  ;;  %vm419_vm0 = vcmask 293888   ;;  %vm1447_vm1 = vcmask 556032  }
   0xc   : > { %s1642_s18 = sshll.u32 %s2573_s17, 3  ;;  %s1705_s27 = sshll.u32 %s2573_s17, 4 }
   0xd   : > { %s1989_s23 = scalar_lea.vmem %s2568_s1, %s1642_s18  ;;  %s2227_s26 = scalar_lea.vmem %s2569_s2, %s1642_s18 }
   0xe   : > { %v253_v1 = vld [vmem:[%s1989_s23 + $0x10] sm:$0xff]  ;;  %v251_v2 = vld [vmem:[%s1989_s23] sm:$0xff]  ;;  %v254_v3 = vld [vmem:[%s1989_s23 + $0x18] sm:$0xff]  ;;  %s2287_s30 = scalar_lea.vmem %s2570_s3, %s1705_s27  ;;  %s2294_s7 = scalar_lea.vmem %s2571_s4, %s1705_s27 }
   0xf   : > { %v367_v4 = vmul.f32 %v1982_v0, %v253_v1  ;;  %v365_v5 = vmul.f32 %v1982_v0, %v251_v2  ;;  %v368_v6 = vmul.f32 %v1982_v0, %v254_v3  ;;  %v252_v7 = vld [vmem:[%s1989_s23 + $0x8] sm:$0xff]  ;;  %v255_v10 = vld [vmem:[%s1989_s23 + $0x20] sm:$0xff]  ;;  %v258_v17 = vld [vmem:[%s1989_s23 + $0x38] sm:$0xff] }
  0x10   : > { %v366_v8 = vmul.f32 %v1982_v0, %v252_v7  ;;  %v256_v9 = vld [vmem:[%s1989_s23 + $0x28] sm:$0xff]  ;;  %v369_v16 = vmul.f32 %v1982_v0, %v255_v10  ;;  %v257_v18 = vld [vmem:[%s1989_s23 + $0x30] sm:$0xff]  ;;  %v372_v21 = vmul.f32 %v1982_v0, %v258_v17  ;;  %v262_v23 = vld [vmem:[%s1989_s23 + $0x58] sm:$0xff] }
  0x11   : > { %v426_v11 = vsel %vm419_vm0, %v367_v4, 0.0  ;;  %v420_v12 = vsel %vm419_vm0, %v365_v5, 0.0  ;;  %v429_v13 = vsel %vm419_vm0, %v368_v6, 0.0  ;;  %v370_v15 = vmul.f32 %v1982_v0, %v256_v9  ;;  %v260_v19 = vld [vmem:[%s1989_s23 + $0x48] sm:$0xff]  ;;  %v259_v25 = vld [vmem:[%s1989_s23 + $0x40] sm:$0xff]  ;;  %v261_v28 = vld [vmem:[%s1989_s23 + $0x50] sm:$0xff] }
  0x12   : > { %427 = vadd.xlane.f32.xlu1 %v426_v11  ;;  %421 = vadd.xlane.f32.xlu0 %v420_v12  ;;  %v423_v14 = vsel %vm419_vm0, %v366_v8, 0.0  ;;  %v432_v22 = vsel %vm419_vm0, %v369_v16, 0.0  ;;  %v371_v24 = vmul.f32 %v1982_v0, %v257_v18  ;;  %v374_v26 = vmul.f32 %v1982_v0, %v260_v19  ;;  %v264_v27 = vld [vmem:[%s1989_s23 + $0x68] sm:$0xff]  ;;  %v286_v31 = vld [vmem:[%s1989_s23 + $0x118] sm:$0xff]  ;;  %v263_v36 = vld [vmem:[%s1989_s23 + $0x60] sm:$0xff] }
  0x13   : > { %v435_v20 = vsel %vm419_vm0, %v370_v15, 0.0  ;;  %v284_v29 = vld [vmem:[%s1989_s23 + $0x108] sm:$0xff]  ;;  %v376_v30 = vmul.f32 %v1982_v0, %v262_v23  ;;  %v441_v32 = vsel %vm419_vm0, %v372_v21, 0.0  ;;  %v266_v34 = vld [vmem:[%s1989_s23 + $0x78] sm:$0xff]  ;;  %v373_v35 = vmul.f32 %v1982_v0, %v259_v25  ;;  %v283_v45 = vld [vmem:[%s1989_s23 + $0x100] sm:$0xff] }
  0x14   : > { %v438_v33 = vsel %vm419_vm0, %v371_v24, 0.0  ;;  %v378_v37 = vmul.f32 %v1982_v0, %v264_v27  ;;  %v375_v38 = vmul.f32 %v1982_v0, %v261_v28  ;;  %v398_v39 = vmul.f32 %v1982_v0, %v284_v29  ;;  %v288_v40 = vld [vmem:[%s1989_s23 + $0x128] sm:$0xff]  ;;  %v290_v41 = vld [vmem:[%s1989_s23 + $0x138] sm:$0xff]  ;;  %v265_v49 = vld [vmem:[%s1989_s23 + $0x70] sm:$0xff] }
  0x15   : > { %v447_v42 = vsel %vm419_vm0, %v374_v26, 0.0  ;;  %v400_v43 = vmul.f32 %v1982_v0, %v286_v31  ;;  %v292_v44 = vld [vmem:[%s1989_s23 + $0x148] sm:$0xff]  ;;  %v453_v46 = vsel %vm419_vm0, %v376_v30, 0.0  ;;  %v2038_v47 = vmul.f32 %v1982_v0, %v266_v34  ;;  %v294_v51 = vld [vmem:[%s1989_s23 + $0x158] sm:$0xff]  ;;  %v285_v56 = vld [vmem:[%s1989_s23 + $0x110] sm:$0xff] }
  0x16   : > { %430 = vadd.xlane.f32.xlu1 %v429_v13  ;;  %424 = vadd.xlane.f32.xlu0 %v423_v14  ;;  %v377_v48 = vmul.f32 %v1982_v0, %v263_v36  ;;  %v2043_v50 = vsel %vm419_vm0, %v398_v39, 0.0  ;;  %v444_v52 = vsel %vm419_vm0, %v373_v35, 0.0  ;;  %v402_v54 = vmul.f32 %v1982_v0, %v288_v40  ;;  %v296_v61 = vld [vmem:[%s1989_s23 + $0x168] sm:$0xff]  ;;  %v287_v62 = vld [vmem:[%s1989_s23 + $0x120] sm:$0xff]  ;;  %v298_v63 = vld [vmem:[%s1989_s23 + $0x178] sm:$0xff] }
  0x17   : > { %v2048_v53 = vsel %vm419_vm0, %v400_v43, 0.0  ;;  %v404_v55 = vmul.f32 %v1982_v0, %v290_v41  ;;  %v459_v57 = vsel %vm419_vm0, %v378_v37, 0.0  ;;  %v450_v58 = vsel %vm419_vm0, %v375_v38, 0.0  ;;  %v289_v5 = vld [vmem:[%s1989_s23 + $0x130] sm:$0xff]  ;;  %v300_v6 = vld [vmem:[%s1989_s23 + $0x188] sm:$0xff]  ;;  %v291_v7 = vld [vmem:[%s1989_s23 + $0x140] sm:$0xff] }
  0x18   : > { %v406_v59 = vmul.f32 %v1982_v0, %v292_v44  ;;  %v397_v60 = vmul.f32 %v1982_v0, %v283_v45  ;;  %v379_v1 = vmul.f32 %v1982_v0, %v265_v49  ;;  %v2062_v2 = vsel %vm419_vm0, %v402_v54, 0.0  ;;  %v302_v12 = vld [vmem:[%s1989_s23 + $0x198] sm:$0xff]  ;;  %v293_v17 = vld [vmem:[%s1989_s23 + $0x150] sm:$0xff]  ;;  %v295_v23 = vld [vmem:[%s1989_s23 + $0x160] sm:$0xff] }
  0x19   : > { %v2065_v3 = vsel %vm419_vm0, %v404_v55, 0.0  ;;  %v408_v4 = vmul.f32 %v1982_v0, %v294_v51  ;;  %v456_v8 = vsel %vm419_vm0, %v377_v48, 0.0  ;;  %v399_v11 = vmul.f32 %v1982_v0, %v285_v56  ;;  %v297_v24 = vld [vmem:[%s1989_s23 + $0x170] sm:$0xff]  ;;  %v299_v29 = vld [vmem:[%s1989_s23 + $0x180] sm:$0xff]  ;;  %v268_v40 = vld [vmem:[%s1989_s23 + $0x88] sm:$0xff] }
  0x1a   : > { %436 = vadd.xlane.f32.xlu1 %v435_v20  ;;  %433 = vadd.xlane.f32.xlu0 %v432_v22  ;;  %v2073_v9 = vsel %vm419_vm0, %v406_v59, 0.0  ;;  %v2076_v10 = vsel %vm419_vm0, %v397_v60, 0.0  ;;  %v410_v14 = vmul.f32 %v1982_v0, %v296_v61  ;;  %v401_v15 = vmul.f32 %v1982_v0, %v287_v62  ;;  %v304_v22 = vld [vmem:[%s1989_s23 + $0x1a8] sm:$0xff]  ;;  %v301_v30 = vld [vmem:[%s1989_s23 + $0x190] sm:$0xff]  ;;  %v303_v31 = vld [vmem:[%s1989_s23 + $0x1a0] sm:$0xff] }
  0x1b   : > { %v2081_v13 = vsel %vm419_vm0, %v408_v4, 0.0  ;;  %v412_v16 = vmul.f32 %v1982_v0, %v298_v63  ;;  %v2088_v18 = vsel %vm419_vm0, %v399_v11, 0.0  ;;  %v403_v19 = vmul.f32 %v1982_v0, %v289_v5  ;;  %v267_v41 = vld [vmem:[%s1989_s23 + $0x80] sm:$0xff]  ;;  %v270_v59 = vld [vmem:[%s1989_s23 + $0x98] sm:$0xff]  ;;  %v269_v60 = vld [vmem:[%s1989_s23 + $0x90] sm:$0xff] }
  0x1c   : > { %v414_v20 = vmul.f32 %v1982_v0, %v300_v6  ;;  %v405_v21 = vmul.f32 %v1982_v0, %v291_v7  ;;  %v2097_v25 = vsel %vm419_vm0, %v410_v14, 0.0  ;;  %v2100_v26 = vsel %vm419_vm0, %v401_v15, 0.0  ;;  %v272_v4 = vld [vmem:[%s1989_s23 + $0xa8] sm:$0xff]  ;;  %v271_v5 = vld [vmem:[%s1989_s23 + $0xa0] sm:$0xff]  ;;  %v274_v11 = vld [vmem:[%s1989_s23 + $0xb8] sm:$0xff] }
  0x1d   : > { %v2103_v27 = vsel %vm419_vm0, %v412_v16, 0.0  ;;  %v416_v28 = vmul.f32 %v1982_v0, %v302_v12  ;;  %v407_v35 = vmul.f32 %v1982_v0, %v293_v17  ;;  %v418_v37 = vmul.f32 %v1982_v0, %v304_v22  ;;  %v273_v12 = vld [vmem:[%s1989_s23 + $0xb0] sm:$0xff] }
  0x1e   : > { %442 = vadd.xlane.f32.xlu1 %v441_v32  ;;  %439 = vadd.xlane.f32.xlu0 %v438_v33  ;;  %v2110_v32 = vsel %vm419_vm0, %v403_v19, 0.0  ;;  %v2113_v33 = vsel %vm419_vm0, %v414_v20, 0.0  ;;  %v2116_v34 = vsel %vm419_vm0, %v405_v21, 0.0  ;;  %v409_v38 = vmul.f32 %v1982_v0, %v295_v23  ;;  %v276_v19 = vld [vmem:[%s1989_s23 + $0xc8] sm:$0xff]  ;;  %v275_v20 = vld [vmem:[%s1989_s23 + $0xc0] sm:$0xff] }
  0x1f   : > { %v2120_v36 = vsel %vm419_vm0, %v416_v28, 0.0  ;;  %v411_v39 = vmul.f32 %v1982_v0, %v297_v24  ;;  %v413_v43 = vmul.f32 %v1982_v0, %v299_v29  ;;  %v415_v44 = vmul.f32 %v1982_v0, %v301_v30  ;;  %v278_v28 = vld [vmem:[%s1989_s23 + $0xd8] sm:$0xff]  ;;  %v277_v29 = vld [vmem:[%s1989_s23 + $0xd0] sm:$0xff] }
  0x20   : > { %v417_v45 = vmul.f32 %v1982_v0, %v303_v31  ;;  %v2137_v48 = vsel %vm419_vm0, %v409_v38, 0.0  ;;  %v465_v55 = vsel %vm419_vm0, %v2038_v47, 0.0  ;;  %v382_v56 = vmul.f32 %v1982_v0, %v268_v40  ;;  %v279_v40 = vld [vmem:[%s1989_s23 + $0xe0] sm:$0xff] }
  0x21   : > { %v2140_v49 = vsel %vm419_vm0, %v411_v39, 0.0  ;;  %v2143_v51 = vsel %vm419_vm0, %v413_v43, 0.0  ;;  %v384_v62 = vmul.f32 %v1982_v0, %v270_v59  ;;  %v383_v47 = vmul.f32 %v1982_v0, %v269_v60  ;;  %v280_v39 = vld [vmem:[%s1989_s23 + $0xe8] sm:$0xff] }
  0x22   : > { %448 = vadd.xlane.f32.xlu1 %v447_v42  ;;  %445 = vadd.xlane.f32.xlu0 %v444_v52  ;;  %v2128_v42 = vsel %vm419_vm0, %v407_v35, 0.0  ;;  %v2146_v52 = vsel %vm419_vm0, %v415_v44, 0.0  ;;  %v2149_v54 = vsel %vm419_vm0, %v417_v45, 0.0  ;;  %v471_v61 = vsel %vm419_vm0, %v382_v56, 0.0  ;;  %v281_v56 = vld [vmem:[%s1989_s23 + $0xf0] sm:$0xff] }
  0x23   : > { %v386_v6 = vmul.f32 %v1982_v0, %v272_v4  ;;  %v474_v7 = vsel %vm419_vm0, %v383_v47, 0.0  ;;  %v388_v15 = vmul.f32 %v1982_v0, %v274_v11  ;;  %v387_v17 = vmul.f32 %v1982_v0, %v273_v12 }
  0x24   : > { %v390_v22 = vmul.f32 %v1982_v0, %v276_v19  ;;  %v389_v24 = vmul.f32 %v1982_v0, %v275_v20  ;;  %v392_v31 = vmul.f32 %v1982_v0, %v278_v28  ;;  %v1942_v38 = vmov 0   ;;  %v313_v20 = vld [vmem:[%s2227_s26 + $0x40] sm:$0xff] }
  0x25   : > { %v483_v14 = vsel %vm419_vm0, %v386_v6, 0.0  ;;  %v489_v21 = vsel %vm419_vm0, %v388_v15, 0.0  ;;  %v486_v23 = vsel %vm419_vm0, %v387_v17, 0.0  ;;  %1716 = vset.pattern.permute.xlu0 %v1942_v38  ;;  %1717 = vset.pattern.permute.xlu1 %v1942_v38  ;;  %v394_v43 = vmul.f32 %v1982_v0, %v280_v39  ;;  %v311_v6 = vld [vmem:[%s2227_s26 + $0x30] sm:$0xff] }
  0x26   : > { %454 = vadd.xlane.f32.xlu1 %v453_v46  ;;  %451 = vadd.xlane.f32.xlu0 %v450_v58  ;;  %v2134_v46 = vsel %vm419_vm0, %v418_v37, 0.0  ;;  %v462_v58 = vsel %vm419_vm0, %v379_v1, 0.0  ;;  %v477_v1 = vsel %vm419_vm0, %v384_v62, 0.0  ;;  %v495_v30 = vsel %vm419_vm0, %v390_v22, 0.0 }
  0x27   : > { %v492_v35 = vsel %vm419_vm0, %v389_v24, 0.0  ;;  %v391_v37 = vmul.f32 %v1982_v0, %v277_v29  ;;  %v393_v45 = vmul.f32 %v1982_v0, %v279_v40  ;;  %v395_v60 = vmul.f32 %v1982_v0, %v281_v56  ;;  %v320_v56 = vld [vmem:[%s2227_s26 + $0x78] sm:$0xff] }
  0x29   : > { %v498_v44 = vsel %vm419_vm0, %v391_v37, 0.0  ;;  %v504_v59 = vsel %vm419_vm0, %v393_v45, 0.0  ;;  %v510_v62 = vsel %vm419_vm0, %v395_v60, 0.0  ;;  %v317_v60 = vld [vmem:[%s2227_s26 + $0x60] sm:$0xff] }
  0x2a   : > { %460 = vadd.xlane.f32.xlu1 %v459_v57  ;;  %457 = vadd.xlane.f32.xlu0 %v456_v8  ;;  %v381_v57 = vmul.f32 %v1982_v0, %v267_v41  ;;  %v385_v8 = vmul.f32 %v1982_v0, %v271_v5  ;;  %v501_v41 = vsel %vm419_vm0, %v392_v31, 0.0 }
  0x2c   : > { %v468_v63 = vsel %vm419_vm0, %v381_v57, 0.0  ;;  %v480_v16 = vsel %vm419_vm0, %v385_v8, 0.0 }
  0x2e   : > { %466 = vadd.xlane.f32.xlu1 %v465_v55  ;;  %463 = vadd.xlane.f32.xlu0 %v462_v58  ;;  %v282_v55 = vld [vmem:[%s1989_s23 + $0xf8] sm:$0xff]  ;;  %v507_v58 = vsel %vm419_vm0, %v394_v43, 0.0 }
  0x2f   : > { %v396_v57 = vmul.f32 %v1982_v0, %v282_v55  ;;  %v307_v0 = vld [vmem:[%s2227_s26 + $0x10] sm:$0xff] }
  0x32   : > { %472 = vadd.xlane.f32.xlu1 %v471_v61  ;;  %469 = vadd.xlane.f32.xlu0 %v468_v63  ;;  %v513_v61 = vsel %vm419_vm0, %v396_v57, 0.0 }
  0x36   : > { %478 = vadd.xlane.f32.xlu1 %v477_v1  ;;  %475 = vadd.xlane.f32.xlu0 %v474_v7  ;;  %v314_v7 = vld [vmem:[%s2227_s26 + $0x48] sm:$0xff] }
  0x3a   : > { %484 = vadd.xlane.f32.xlu1 %v483_v14  ;;  %481 = vadd.xlane.f32.xlu0 %v480_v16  ;;  %v316_v16 = vld [vmem:[%s2227_s26 + $0x58] sm:$0xff] }
  0x3e   : > { %490 = vadd.xlane.f32.xlu1 %v489_v21  ;;  %487 = vadd.xlane.f32.xlu0 %v486_v23 }
  0x42   : > { %496 = vadd.xlane.f32.xlu1 %v495_v30  ;;  %493 = vadd.xlane.f32.xlu0 %v492_v35  ;;  %v318_v30 = vld [vmem:[%s2227_s26 + $0x68] sm:$0xff]  ;;  %v315_v35 = vld [vmem:[%s2227_s26 + $0x50] sm:$0xff] }
  0x46   : > { %502 = vadd.xlane.f32.xlu1 %v501_v41  ;;  %499 = vadd.xlane.f32.xlu0 %v498_v44 }
  0x4a   : > { %508 = vadd.xlane.f32.xlu1 %v507_v58  ;;  %505 = vadd.xlane.f32.xlu0 %v504_v59 }
  0x4e   : > { %514 = vadd.xlane.f32.xlu1 %v513_v61  ;;  %511 = vadd.xlane.f32.xlu0 %v510_v62 }
  0x52   : > { %520 = vadd.xlane.f32.xlu1 %v2043_v50  ;;  %517 = vadd.xlane.f32.xlu0 %v2076_v10  ;;  %v305_v50 = vld [vmem:[%s2227_s26] sm:$0xff]  ;;  %v308_v10 = vld [vmem:[%s2227_s26 + $0x18] sm:$0xff] }
  0x56   : > { %526 = vadd.xlane.f32.xlu1 %v2048_v53  ;;  %523 = vadd.xlane.f32.xlu0 %v2088_v18 }
  0x5a   : > { %532 = vadd.xlane.f32.xlu1 %v2062_v2  ;;  %529 = vadd.xlane.f32.xlu0 %v2100_v26 }
  0x5e   : > { %538 = vadd.xlane.f32.xlu1 %v2065_v3  ;;  %535 = vadd.xlane.f32.xlu0 %v2110_v32 }
  0x62   : > { %544 = vadd.xlane.f32.xlu1 %v2073_v9  ;;  %541 = vadd.xlane.f32.xlu0 %v2116_v34  ;;  %v310_v34 = vld [vmem:[%s2227_s26 + $0x28] sm:$0xff] }
  0x66   : > { %550 = vadd.xlane.f32.xlu1 %v2081_v13  ;;  %547 = vadd.xlane.f32.xlu0 %v2128_v42  ;;  %v306_v13 = vld [vmem:[%s2227_s26 + $0x8] sm:$0xff] }
  0x6a   : > { %556 = vadd.xlane.f32.xlu1 %v2097_v25  ;;  %553 = vadd.xlane.f32.xlu0 %v2137_v48 }
  0x6e   : > { %562 = vadd.xlane.f32.xlu1 %v2103_v27  ;;  %559 = vadd.xlane.f32.xlu0 %v2140_v49 }
  0x72   : > { %568 = vadd.xlane.f32.xlu1 %v2113_v33  ;;  %565 = vadd.xlane.f32.xlu0 %v2143_v51 }
  0x76   : > { %574 = vadd.xlane.f32.xlu1 %v2120_v36  ;;  %571 = vadd.xlane.f32.xlu0 %v2146_v52  ;;  %v309_v36 = vld [vmem:[%s2227_s26 + $0x20] sm:$0xff] }
  0x7a   : > { %580 = vadd.xlane.f32.xlu1 %v2134_v46  ;;  %577 = vadd.xlane.f32.xlu0 %v2149_v54  ;;  %v312_v54 = vld [vmem:[%s2227_s26 + $0x38] sm:$0xff] }
  0x9b   : > { %v428_v53 = vpop.xlane.xlu1 %427  ;;  %v422_v2 = vpop.xlane.xlu0 %421 }
  0x9c   : > { %v584_v3 = vadd.f32 %v428_v53, %v307_v0  ;;  %v582_v9 = vadd.f32 %v422_v2, %v305_v50 }
  0x9e   : > { %v1649_v18 = vmul.f32 -1.442695, %v582_v9  ;;  %v1651_v25 = vmul.f32 -1.442695, %v584_v3  ;;  %v322_v9 = vld [vmem:[%s2227_s26 + $0x88] sm:$0xff] }
  0x9f   : > { %v431_v26 = vpop.xlane.xlu1 %430  ;;  %v425_v27 = vpop.xlane.xlu0 %424 }
  0xa0   : > { %v585_v32 = vadd.f32 %v431_v26, %v308_v10  ;;  %v583_v33 = vadd.f32 %v425_v27, %v306_v13  ;;  %1718 = vpow2.f32 %v1649_v18  ;;  %v319_v18 = vld [vmem:[%s2227_s26 + $0x70] sm:$0xff] }
  0xa1   : > { %1720 = vpow2.f32 %v1651_v25 }
  0xa2   : > { %v1650_v42 = vmul.f32 -1.442695, %v583_v33  ;;  %v1652_v46 = vmul.f32 -1.442695, %v585_v32 }
  0xa3   : > { %v437_v48 = vpop.xlane.xlu1 %436  ;;  %v434_v49 = vpop.xlane.xlu0 %433 }
  0xa4   : > { %v587_v51 = vadd.f32 %v437_v48, %v310_v34  ;;  %v586_v52 = vadd.f32 %v434_v49, %v309_v36  ;;  %1722 = vpow2.f32 %v1650_v42  ;;  %v324_v34 = vld [vmem:[%s2227_s26 + $0x98] sm:$0xff]  ;;  %v321_v49 = vld [vmem:[%s2227_s26 + $0x80] sm:$0xff] }
  0xa5   : > { %1724 = vpow2.f32 %v1652_v46 }
  0xa6   : > { %v1654_v63 = vmul.f32 -1.442695, %v587_v51  ;;  %v1653_v4 = vmul.f32 -1.442695, %v586_v52 }
  0xa7   : > { %v443_v47 = vpop.xlane.xlu1 %442  ;;  %v440_v5 = vpop.xlane.xlu0 %439 }
  0xa8   : > { %v589_v1 = vadd.f32 %v443_v47, %v312_v54  ;;  %1726 = vpow2.f32 %v1654_v63  ;;  %v588_v12 = vadd.f32 %v440_v5, %v311_v6  ;;  %v326_v6 = vld [vmem:[%s2227_s26 + $0xa8] sm:$0xff] }
  0xa9   : > { %1728 = vpow2.f32 %v1653_v4 }
  0xaa   : > { %v1656_v8 = vmul.f32 -1.442695, %v589_v1  ;;  %v1655_v23 = vmul.f32 -1.442695, %v588_v12  ;;  %v323_v1 = vld [vmem:[%s2227_s26 + $0x90] sm:$0xff] }
  0xab   : > { %v449_v11 = vpop.xlane.xlu1 %448  ;;  %v446_v14 = vpop.xlane.xlu0 %445 }
  0xac   : > { %v591_v15 = vadd.f32 %v449_v11, %v314_v7  ;;  %1730 = vpow2.f32 %v1656_v8  ;;  %v590_v31 = vadd.f32 %v446_v14, %v313_v20  ;;  %v325_v14 = vld [vmem:[%s2227_s26 + $0xa0] sm:$0xff] }
  0xad   : > { %v1719_v17 = vpop.eup %1718 }
  0xae   : > { %v1658_v19 = vmul.f32 -1.442695, %v591_v15  ;;  %v798_v21 = vadd.f32 1.0, %v1719_v17  ;;  %v1721_v28 = vpop.eup %1720  ;;  %v1657_v58 = vmul.f32 -1.442695, %v590_v31 }
  0xaf   : > { %v455_v22 = vpop.xlane.xlu1 %454  ;;  %v452_v24 = vpop.xlane.xlu0 %451  ;;  %v800_v39 = vadd.f32 1.0, %v1721_v28 }
  0xb0   : > { %v593_v29 = vadd.f32 %v455_v22, %v316_v16  ;;  %1732 = vrcp.f32 %v798_v21  ;;  %v592_v55 = vadd.f32 %v452_v24, %v315_v35  ;;  %v328_v24 = vld [vmem:[%s2227_s26 + $0xb8] sm:$0xff] }
  0xb1   : > { %v1723_v37 = vpop.eup %1722  ;;  %1734 = vpow2.f32 %v1658_v19 }
  0xb2   : > { %v1660_v38 = vmul.f32 -1.442695, %v593_v29  ;;  %v799_v40 = vadd.f32 1.0, %v1723_v37  ;;  %1736 = vpow2.f32 %v1655_v23  ;;  %v1725_v44 = vpop.eup %1724  ;;  %v1659_v2 = vmul.f32 -1.442695, %v592_v55  ;;  %v330_v55 = vld [vmem:[%s2227_s26 + $0xc8] sm:$0xff] }
  0xb3   : > { %v461_v41 = vpop.xlane.xlu1 %460  ;;  %v458_v43 = vpop.xlane.xlu0 %457  ;;  %v801_v61 = vadd.f32 1.0, %v1725_v44 }
  0xb4   : > { %v595_v45 = vadd.f32 %v461_v41, %v318_v30  ;;  %1738 = vrcp.f32 %v799_v40  ;;  %v594_v10 = vadd.f32 %v458_v43, %v317_v60 }
  0xb5   : > { %v1727_v57 = vpop.eup %1726  ;;  %1740 = vpow2.f32 %v1660_v38 }
  0xb6   : > { %v1662_v59 = vmul.f32 -1.442695, %v595_v45  ;;  %1742 = vrcp.f32 %v800_v39  ;;  %v1729_v50 = vpop.eup %1728  ;;  %v803_v3 = vadd.f32 1.0, %v1727_v57  ;;  %v1661_v36 = vmul.f32 -1.442695, %v594_v10  ;;  %v327_v39 = vld [vmem:[%s2227_s26 + $0xb0] sm:$0xff] }
  0xb7   : > { %v467_v62 = vpop.xlane.xlu1 %466  ;;  %v464_v0 = vpop.xlane.xlu0 %463  ;;  %1744 = vpow2.f32 %v1657_v58  ;;  %v802_v25 = vadd.f32 1.0, %v1729_v50  ;;  %v332_v10 = vld [vmem:[%s2227_s26 + $0xd8] sm:$0xff] }
  0xb8   : > { %v597_v53 = vadd.f32 %v467_v62, %v320_v56  ;;  %1746 = vpow2.f32 %v1662_v59  ;;  %v596_v42 = vadd.f32 %v464_v0, %v319_v18 }
  0xb9   : > { %1748 = vrcp.f32 %v801_v61  ;;  %v1731_v32 = vpop.eup %1730 }
  0xba   : > { %v1664_v13 = vmul.f32 -1.442695, %v597_v53  ;;  %1750 = vpow2.f32 %v1659_v2  ;;  %v805_v52 = vadd.f32 1.0, %v1731_v32  ;;  %v1663_v7 = vmul.f32 -1.442695, %v596_v42 }
  0xbb   : > { %v473_v26 = vpop.xlane.xlu1 %472  ;;  %v470_v27 = vpop.xlane.xlu0 %469  ;;  %1752 = vrcp.f32 %v803_v3  ;;  %v329_v3 = vld [vmem:[%s2227_s26 + $0xc0] sm:$0xff] }
  0xbc   : > { %v599_v33 = vadd.f32 %v473_v26, %v322_v9  ;;  %1754 = vpow2.f32 %v1664_v13  ;;  %v598_v8 = vadd.f32 %v470_v27, %v321_v49 }
  0xbd   : > { %v1733_v46 = vpop.eup %1732  ;;  %1756 = vrcp.f32 %v802_v25 }
  0xbe   : > { %v1666_v48 = vmul.f32 -1.442695, %v599_v33  ;;  %v1735_v51 = vpop.eup %1734  ;;  %1070 = vperm.xlu0 %1716, %v1733_v46   ;;  %v1665_v28 = vmul.f32 -1.442695, %v598_v8 }
  0xbf   : > { %v479_v54 = vpop.xlane.xlu1 %478  ;;  %v476_v63 = vpop.xlane.xlu0 %475  ;;  %v807_v4 = vadd.f32 1.0, %v1735_v51  ;;  %v334_v51 = vld [vmem:[%s2227_s26 + $0xe8] sm:$0xff] }
  0xc0   : > { %v1737_v47 = vpop.eup %1736  ;;  %1758 = vpow2.f32 %v1666_v48  ;;  %v601_v5 = vadd.f32 %v479_v54, %v324_v34  ;;  %v600_v19 = vadd.f32 %v476_v63, %v323_v1  ;;  %v331_v48 = vld [vmem:[%s2227_s26 + $0xd0] sm:$0xff] }
  0xc1   : > { %1760 = vpow2.f32 %v1661_v36  ;;  %v1739_v11 = vpop.eup %1738  ;;  %v804_v16 = vadd.f32 1.0, %v1737_v47 }
  0xc2   : > { %1762 = vrcp.f32 %v807_v4  ;;  %v1668_v12 = vmul.f32 -1.442695, %v601_v5  ;;  %v1741_v15 = vpop.eup %1740  ;;  %1075 = vperm.xlu1 %1717, %v1739_v11   ;;  %v1667_v38 = vmul.f32 -1.442695, %v600_v19 }
  0xc3   : > { %1764 = vrcp.f32 %v805_v52  ;;  %v485_v17 = vpop.xlane.xlu1 %484  ;;  %v482_v20 = vpop.xlane.xlu0 %481  ;;  %v809_v22 = vadd.f32 1.0, %v1741_v15 }
  0xc4   : > { %v1743_v21 = vpop.eup %1742  ;;  %1766 = vpow2.f32 %v1668_v12  ;;  %v603_v23 = vadd.f32 %v485_v17, %v326_v6  ;;  %v602_v29 = vadd.f32 %v482_v20, %v325_v14  ;;  %v336_v14 = vld [vmem:[%s2227_s26 + $0xf8] sm:$0xff] }
  0xc5   : > { %1768 = vpow2.f32 %v1663_v7  ;;  %v1745_v30 = vpop.eup %1744 }
  0xc6   : > { %1770 = vrcp.f32 %v809_v22  ;;  %v1670_v31 = vmul.f32 -1.442695, %v603_v23  ;;  %v1747_v35 = vpop.eup %1746  ;;  %1080 = vperm.xlu1 %1717, %v1743_v21   ;;  %v1669_v56 = vmul.f32 -1.442695, %v602_v29  ;;  %v806_v61 = vadd.f32 1.0, %v1745_v30  ;;  %v333_v29 = vld [vmem:[%s2227_s26 + $0xe0] sm:$0xff] }
  0xc7   : > { %1772 = vrcp.f32 %v804_v16  ;;  %v491_v37 = vpop.xlane.xlu1 %490  ;;  %v488_v40 = vpop.xlane.xlu0 %487  ;;  %v811_v43 = vadd.f32 1.0, %v1747_v35 }
  0xc8   : > { %v1749_v41 = vpop.eup %1748  ;;  %1774 = vpow2.f32 %v1670_v31  ;;  %v605_v44 = vadd.f32 %v491_v37, %v328_v24  ;;  %v604_v59 = vadd.f32 %v488_v40, %v327_v39  ;;  %v338_v31 = vld [vmem:[%s2227_s26 + $0x108] sm:$0xff] }
  0xc9   : > { %v1751_v45 = vpop.eup %1750  ;;  %1776 = vpow2.f32 %v1665_v28 }
  0xca   : > { %v1753_v58 = vpop.eup %1752  ;;  %1778 = vrcp.f32 %v811_v43  ;;  %v1672_v57 = vmul.f32 -1.442695, %v605_v44  ;;  %1085 = vperm.xlu1 %1717, %v1749_v41   ;;  %v1671_v26 = vmul.f32 -1.442695, %v604_v59  ;;  %v808_v32 = vadd.f32 1.0, %v1751_v45  ;;  %v340_v59 = vld [vmem:[%s2227_s26 + $0x118] sm:$0xff] }
  0xcb   : > { %v1755_v60 = vpop.eup %1754  ;;  %v497_v62 = vpop.xlane.xlu1 %496  ;;  %1780 = vpow2.f32 %v1667_v38 }
  0xcc   : > { %v494_v0 = vpop.xlane.xlu0 %493  ;;  %v1757_v50 = vpop.eup %1756  ;;  %v813_v53 = vadd.f32 1.0, %v1755_v60  ;;  %1782 = vpow2.f32 %v1672_v57  ;;  %v607_v2 = vadd.f32 %v497_v62, %v330_v55 }
  0xcd   : > { %v1759_v9 = vpop.eup %1758  ;;  %1784 = vpow2.f32 %v1669_v56  ;;  %v606_v34 = vadd.f32 %v494_v0, %v329_v3 }
  0xce   : > { %v1761_v13 = vpop.eup %1760  ;;  %1786 = vrcp.f32 %v813_v53  ;;  %v815_v18 = vadd.f32 1.0, %v1759_v9  ;;  %v1674_v25 = vmul.f32 -1.442695, %v607_v2  ;;  %1090 = vperm.xlu1 %1717, %v1757_v50   ;;  %v337_v9 = vld [vmem:[%s2227_s26 + $0x100] sm:$0xff] }
  0xcf   : > { %v1763_v27 = vpop.eup %1762  ;;  %1788 = vrcp.f32 %v806_v61  ;;  %v503_v33 = vpop.xlane.xlu1 %502  ;;  %v810_v63 = vadd.f32 1.0, %v1761_v13  ;;  %v1673_v1 = vmul.f32 -1.442695, %v606_v34 }
  0xd0   : > { %v500_v36 = vpop.xlane.xlu0 %499  ;;  %v1765_v42 = vpop.eup %1764  ;;  %1790 = vrcp.f32 %v815_v18  ;;  %1115 = vperm.xlu0 %1716, %v1763_v27   ;;  %v609_v46 = vadd.f32 %v503_v33, %v332_v10 }
  0xd1   : > { %v1767_v49 = vpop.eup %1766  ;;  %1792 = vpow2.f32 %v1674_v25  ;;  %v608_v6 = vadd.f32 %v500_v36, %v331_v48 }
  0xd2   : > { %v1769_v52 = vpop.eup %1768  ;;  %v817_v54 = vadd.f32 1.0, %v1767_v49  ;;  %v1676_v47 = vmul.f32 -1.442695, %v609_v46  ;;  %1794 = vpow2.f32 %v1671_v26  ;;  %1095 = vperm.xlu1 %1717, %v1753_v58   ;;  %v335_v58 = vld [vmem:[%s2227_s26 + $0xf0] sm:$0xff]  ;;  %v342_v26 = vld [vmem:[%s2227_s26 + $0x128] sm:$0xff] }
  0xd3   : > { %v1771_v4 = vpop.eup %1770  ;;  %1796 = vrcp.f32 %v808_v32  ;;  %v509_v5 = vpop.xlane.xlu1 %508  ;;  %v812_v17 = vadd.f32 1.0, %v1769_v52  ;;  %v1675_v22 = vmul.f32 -1.442695, %v608_v6  ;;  %v339_v49 = vld [vmem:[%s2227_s26 + $0x110] sm:$0xff] }
  0xd4   : > { %v506_v7 = vpop.xlane.xlu0 %505  ;;  %v1773_v8 = vpop.eup %1772  ;;  %1798 = vrcp.f32 %v817_v54  ;;  %1125 = vperm.xlu0 %1716, %v1771_v4   ;;  %v611_v11 = vadd.f32 %v509_v5, %v334_v51 }
  0xd5   : > { %v1775_v12 = vpop.eup %1774  ;;  %1800 = vpow2.f32 %v1676_v47  ;;  %v610_v44 = vadd.f32 %v506_v7, %v333_v29  ;;  %v344_v47 = vld [vmem:[%s2227_s26 + $0x138] sm:$0xff] }
  0xd6   : > { %v1777_v15 = vpop.eup %1776  ;;  %v819_v16 = vadd.f32 1.0, %v1775_v12  ;;  %1802 = vrcp.f32 %v810_v63  ;;  %v1678_v19 = vmul.f32 -1.442695, %v611_v11  ;;  %1100 = vperm.xlu1 %1717, %v1773_v8  }
  0xd7   : > { %v1779_v20 = vpop.eup %1778  ;;  %v515_v21 = vpop.xlane.xlu1 %514  ;;  %1804 = vpow2.f32 %v1673_v1  ;;  %v814_v38 = vadd.f32 1.0, %v1777_v15  ;;  %v1677_v2 = vmul.f32 -1.442695, %v610_v44 }
  0xd8   : > { %v512_v23 = vpop.xlane.xlu0 %511  ;;  %v1781_v24 = vpop.eup %1780  ;;  %1806 = vrcp.f32 %v819_v16  ;;  %1135 = vperm.xlu0 %1716, %v1779_v20   ;;  %v613_v28 = vadd.f32 %v515_v21, %v336_v14  ;;  %v341_v14 = vld [vmem:[%s2227_s26 + $0x120] sm:$0xff]  ;;  %v346_v21 = vld [vmem:[%s2227_s26 + $0x148] sm:$0xff] }
  0xd9   : > { %v1783_v30 = vpop.eup %1782  ;;  %1808 = vpow2.f32 %v1678_v19  ;;  %v816_v41 = vadd.f32 1.0, %v1781_v24  ;;  %v612_v3 = vadd.f32 %v512_v23, %v335_v58  ;;  %v343_v19 = vld [vmem:[%s2227_s26 + $0x130] sm:$0xff] }
  0xda   : > { %v1785_v35 = vpop.eup %1784  ;;  %v821_v37 = vadd.f32 1.0, %v1783_v30  ;;  %1810 = vrcp.f32 %v812_v17  ;;  %v1680_v39 = vmul.f32 -1.442695, %v613_v28  ;;  %1105 = vperm.xlu1 %1717, %v1765_v42  }
  0xdb   : > { %v1787_v40 = vpop.eup %1786  ;;  %v521_v43 = vpop.xlane.xlu1 %520  ;;  %1812 = vpow2.f32 %v1675_v22  ;;  %v818_v61 = vadd.f32 1.0, %v1785_v35  ;;  %v1679_v48 = vmul.f32 -1.442695, %v612_v3 }
  0xdc   : > { %v518_v45 = vpop.xlane.xlu0 %517  ;;  %v1789_v55 = vpop.eup %1788  ;;  %1814 = vrcp.f32 %v821_v37  ;;  %1145 = vperm.xlu0 %1716, %v1787_v40   ;;  %v615_v56 = vadd.f32 %v521_v43, %v338_v31  ;;  %v348_v43 = vld [vmem:[%s2227_s26 + $0x158] sm:$0xff] }
  0xdd   : > { %v1791_v57 = vpop.eup %1790  ;;  %1816 = vpow2.f32 %v1680_v39  ;;  %v614_v34 = vadd.f32 %v518_v45, %v337_v9 }
  0xde   : > { %v1793_v60 = vpop.eup %1792  ;;  %1818 = vrcp.f32 %v814_v38  ;;  %v1682_v62 = vmul.f32 -1.442695, %v615_v56  ;;  %1110 = vperm.xlu1 %1717, %v1789_v55  }
  0xdf   : > { %v1795_v0 = vpop.eup %1794  ;;  %v823_v50 = vadd.f32 1.0, %v1793_v60  ;;  %1820 = vrcp.f32 %v816_v41  ;;  %v527_v53 = vpop.xlane.xlu1 %526  ;;  %v1681_v1 = vmul.f32 -1.442695, %v614_v34  ;;  %v345_v60 = vld [vmem:[%s2227_s26 + $0x140] sm:$0xff] }
  0xe0   : > { %v524_v10 = vpop.xlane.xlu0 %523  ;;  %v1797_v13 = vpop.eup %1796  ;;  %1822 = vpow2.f32 %v1682_v62  ;;  %1155 = vperm.xlu0 %1716, %v1791_v57   ;;  %v617_v18 = vadd.f32 %v527_v53, %v340_v59  ;;  %v820_v32 = vadd.f32 1.0, %v1795_v0  ;;  %v350_v53 = vld [vmem:[%s2227_s26 + $0x168] sm:$0xff] }
  0xe1   : > { %v1799_v25 = vpop.eup %1798  ;;  %1824 = vrcp.f32 %v823_v50  ;;  %v616_v6 = vadd.f32 %v524_v10, %v339_v49 }
  0xe2   : > { %v1801_v27 = vpop.eup %1800  ;;  %1826 = vrcp.f32 %v818_v61  ;;  %v1684_v33 = vmul.f32 -1.442695, %v617_v18  ;;  %1120 = vperm.xlu1 %1717, %v1797_v13  }
  0xe3   : > { %v1803_v36 = vpop.eup %1802  ;;  %v825_v42 = vadd.f32 1.0, %v1801_v27  ;;  %v533_v46 = vpop.xlane.xlu1 %532  ;;  %1828 = vpow2.f32 %v1677_v2  ;;  %v1683_v24 = vmul.f32 -1.442695, %v616_v6 }
  0xe4   : > { %v530_v51 = vpop.xlane.xlu0 %529  ;;  %v1805_v52 = vpop.eup %1804  ;;  %1830 = vpow2.f32 %v1684_v33  ;;  %1165 = vperm.xlu0 %1716, %v1799_v25   ;;  %v619_v54 = vadd.f32 %v533_v46, %v342_v26  ;;  %v347_v26 = vld [vmem:[%s2227_s26 + $0x150] sm:$0xff] }
  0xe5   : > { %v1807_v63 = vpop.eup %1806  ;;  %1832 = vrcp.f32 %v825_v42  ;;  %v822_v11 = vadd.f32 1.0, %v1805_v52  ;;  %v618_v28 = vadd.f32 %v530_v51, %v341_v14 }
  0xe6   : > { %v1809_v4 = vpop.eup %1808  ;;  %1834 = vrcp.f32 %v820_v32  ;;  %v1686_v5 = vmul.f32 -1.442695, %v619_v54  ;;  %1130 = vperm.xlu1 %1717, %v1803_v36   ;;  %v352_v36 = vld [vmem:[%s2227_s26 + $0x178] sm:$0xff] }
  0xe7   : > { %v1811_v7 = vpop.eup %1810  ;;  %v827_v8 = vadd.f32 1.0, %v1809_v4  ;;  %v539_v12 = vpop.xlane.xlu1 %538  ;;  %1836 = vpow2.f32 %v1679_v48  ;;  %v1685_v56 = vmul.f32 -1.442695, %v618_v28  ;;  %v356_v28 = vld [vmem:[%s2227_s26 + $0x198] sm:$0xff] }
  0xe8   : > { %v536_v15 = vpop.xlane.xlu0 %535  ;;  %v1813_v16 = vpop.eup %1812  ;;  %1838 = vpow2.f32 %v1686_v5  ;;  %1175 = vperm.xlu0 %1716, %v1807_v63   ;;  %v621_v17 = vadd.f32 %v539_v12, %v344_v47 }
  0xe9   : > { %v1815_v20 = vpop.eup %1814  ;;  %1840 = vrcp.f32 %v827_v8  ;;  %v824_v31 = vadd.f32 1.0, %v1813_v16  ;;  %v620_v37 = vadd.f32 %v536_v15, %v343_v19 }
  0xea   : > { %v1817_v22 = vpop.eup %1816  ;;  %v1688_v23 = vmul.f32 -1.442695, %v621_v17  ;;  %1842 = vpow2.f32 %v1681_v1  ;;  %1140 = vperm.xlu1 %1717, %v1811_v7   ;;  %v349_v1 = vld [vmem:[%s2227_s26 + $0x160] sm:$0xff]  ;;  %v354_v7 = vld [vmem:[%s2227_s26 + $0x188] sm:$0xff] }
  0xeb   : > { %v1819_v29 = vpop.eup %1818  ;;  %v829_v30 = vadd.f32 1.0, %v1817_v22  ;;  %1844 = vrcp.f32 %v822_v11  ;;  %v545_v35 = vpop.xlane.xlu1 %544  ;;  %v1687_v59 = vmul.f32 -1.442695, %v620_v37  ;;  %v351_v22 = vld [vmem:[%s2227_s26 + $0x170] sm:$0xff] }
  0xec   : > { %v542_v38 = vpop.xlane.xlu0 %541  ;;  %v1821_v39 = vpop.eup %1820  ;;  %1846 = vpow2.f32 %v1688_v23  ;;  %1185 = vperm.xlu0 %1716, %v1815_v20   ;;  %v623_v40 = vadd.f32 %v545_v35, %v346_v21 }
  0xed   : > { %v1823_v41 = vpop.eup %1822  ;;  %1848 = vrcp.f32 %v829_v30  ;;  %v622_v10 = vadd.f32 %v542_v38, %v345_v60 }
  0xee   : > { %v1825_v44 = vpop.eup %1824  ;;  %v831_v45 = vadd.f32 1.0, %v1823_v41  ;;  %v1690_v55 = vmul.f32 -1.442695, %v623_v40  ;;  %1850 = vpow2.f32 %v1683_v24  ;;  %1150 = vperm.xlu1 %1717, %v1819_v29  }
  0xef   : > { %v1827_v58 = vpop.eup %1826  ;;  %1852 = vrcp.f32 %v824_v31  ;;  %v551_v57 = vpop.xlane.xlu1 %550  ;;  %v1689_v49 = vmul.f32 -1.442695, %v622_v10 }
  0xf0   : > { %v548_v61 = vpop.xlane.xlu0 %547  ;;  %v1829_v62 = vpop.eup %1828  ;;  %1854 = vrcp.f32 %v831_v45  ;;  %1195 = vperm.xlu0 %1716, %v1825_v44   ;;  %v625_v0 = vadd.f32 %v551_v57, %v348_v43  ;;  %v353_v44 = vld [vmem:[%s2227_s26 + $0x180] sm:$0xff] }
  0xf1   : > { %v1831_v50 = vpop.eup %1830  ;;  %1856 = vpow2.f32 %v1690_v55  ;;  %v826_v18 = vadd.f32 1.0, %v1829_v62  ;;  %v624_v51 = vadd.f32 %v548_v61, %v347_v26  ;;  %v358_v55 = vld [vmem:[%s2227_s26 + $0x1a8] sm:$0xff] }
  0xf2   : > { %v1833_v2 = vpop.eup %1832  ;;  %v833_v3 = vadd.f32 1.0, %v1831_v50  ;;  %v1692_v9 = vmul.f32 -1.442695, %v625_v0  ;;  %1858 = vpow2.f32 %v1685_v56  ;;  %1160 = vperm.xlu1 %1717, %v1821_v39  }
  0xf3   : > { %v1835_v13 = vpop.eup %1834  ;;  %v557_v25 = vpop.xlane.xlu1 %556  ;;  %1860 = vpow2.f32 %v1687_v59  ;;  %v1691_v14 = vmul.f32 -1.442695, %v624_v51 }
  0xf4   : > { %v554_v27 = vpop.xlane.xlu0 %553  ;;  %v1837_v32 = vpop.eup %1836  ;;  %1862 = vrcp.f32 %v833_v3  ;;  %1205 = vperm.xlu0 %1716, %v1833_v2   ;;  %v627_v33 = vadd.f32 %v557_v25, %v350_v53  ;;  %v355_v2 = vld [vmem:[%s2227_s26 + $0x190] sm:$0xff] }
  0xf5   : > { %v1839_v34 = vpop.eup %1838  ;;  %1864 = vpow2.f32 %v1692_v9  ;;  %v828_v54 = vadd.f32 1.0, %v1837_v32  ;;  %v626_v19 = vadd.f32 %v554_v27, %v349_v1 }
  0xf6   : > { %v1841_v42 = vpop.eup %1840  ;;  %v835_v46 = vadd.f32 1.0, %v1839_v34  ;;  %v1694_v48 = vmul.f32 -1.442695, %v627_v33  ;;  %1866 = vrcp.f32 %v826_v18  ;;  %1170 = vperm.xlu1 %1717, %v1827_v58   ;;  %v357_v33 = vld [vmem:[%s2227_s26 + $0x1a0] sm:$0xff] }
  0xf7   : > { %v1843_v52 = vpop.eup %1842  ;;  %v563_v63 = vpop.xlane.xlu1 %562  ;;  %v1693_v39 = vmul.f32 -1.442695, %v626_v19 }
  0xf8   : > { %v560_v47 = vpop.xlane.xlu0 %559  ;;  %v1845_v4 = vpop.eup %1844  ;;  %1868 = vrcp.f32 %v835_v46  ;;  %1215 = vperm.xlu0 %1716, %v1841_v42   ;;  %v629_v5 = vadd.f32 %v563_v63, %v352_v36  ;;  %v830_v16 = vadd.f32 1.0, %v1843_v52 }
  0xf9   : > { %v1847_v6 = vpop.eup %1846  ;;  %1870 = vpow2.f32 %v1694_v48  ;;  %v628_v40 = vadd.f32 %v560_v47, %v351_v22 }
  0xfa   : > { %v1849_v8 = vpop.eup %1848  ;;  %v837_v11 = vadd.f32 1.0, %v1847_v6  ;;  %v1696_v12 = vmul.f32 -1.442695, %v629_v5  ;;  %1872 = vpow2.f32 %v1689_v49  ;;  %1180 = vperm.xlu1 %1717, %v1835_v13  }
  0xfb   : > { %v1851_v15 = vpop.eup %1850  ;;  %1874 = vrcp.f32 %v828_v54  ;;  %v569_v17 = vpop.xlane.xlu1 %568  ;;  %v1695_v62 = vmul.f32 -1.442695, %v628_v40 }
  0xfc   : > { %v1853_v20 = vpop.eup %1852  ;;  %1876 = vrcp.f32 %v837_v11  ;;  %1225 = vperm.xlu0 %1716, %v1849_v8   ;;  %v631_v21 = vadd.f32 %v569_v17, %v354_v7  ;;  %v566_v23 = vpop.xlane.xlu0 %565  ;;  %v832_v30 = vadd.f32 1.0, %v1851_v15 }
  0xfd   : > { %v1855_v24 = vpop.eup %1854  ;;  %1878 = vpow2.f32 %v1696_v12  ;;  %v630_v0 = vadd.f32 %v566_v23, %v353_v44 }
  0xfe   : > { %v1857_v29 = vpop.eup %1856  ;;  %v1698_v31 = vmul.f32 -1.442695, %v631_v21  ;;  %1880 = vpow2.f32 %v1691_v14  ;;  %1190 = vperm.xlu1 %1717, %v1845_v4  }
  0xff   : > { %v1859_v35 = vpop.eup %1858  ;;  %v839_v37 = vadd.f32 1.0, %v1857_v29  ;;  %1882 = vrcp.f32 %v830_v16  ;;  %v575_v38 = vpop.xlane.xlu1 %574  ;;  %v1697_v26 = vmul.f32 -1.442695, %v630_v0  ;;  %v963_v0 = vld [vmem:[%s2287_s30 + $0x18] sm:$0xff] }
 0x100   : > { %v1861_v41 = vpop.eup %1860  ;;  %1884 = vpow2.f32 %v1698_v31  ;;  %1235 = vperm.xlu0 %1716, %v1855_v24   ;;  %v633_v43 = vadd.f32 %v575_v38, %v356_v28  ;;  %v834_v58 = vadd.f32 1.0, %v1859_v35  ;;  %v572_v59 = vpop.xlane.xlu0 %571 }
 0x101   : > { %v1863_v45 = vpop.eup %1862  ;;  %1886 = vrcp.f32 %v839_v37  ;;  %v836_v10 = vadd.f32 1.0, %v1861_v41  ;;  %v632_v27 = vadd.f32 %v572_v59, %v355_v2 }
 0x102   : > { %v1865_v56 = vpop.eup %1864  ;;  %1888 = vrcp.f32 %v832_v30  ;;  %v1700_v57 = vmul.f32 -1.442695, %v633_v43  ;;  %1200 = vperm.xlu1 %1717, %v1853_v20  }
 0x103   : > { %v841_v60 = vadd.f32 1.0, %v1865_v56  ;;  %v581_v61 = vpop.xlane.xlu1 %580  ;;  %1890 = vpow2.f32 %v1693_v39  ;;  %v1867_v50 = vpop.eup %1866  ;;  %v1699_v51 = vmul.f32 -1.442695, %v632_v27 }
 0x104   : > { %1892 = vpow2.f32 %v1700_v57  ;;  %1245 = vperm.xlu0 %1716, %v1863_v45   ;;  %v635_v53 = vadd.f32 %v581_v61, %v358_v55  ;;  %v578_v34 = vpop.xlane.xlu0 %577  ;;  %v961_v57 = vld [vmem:[%s2287_s30 + $0x8] sm:$0xff] }
 0x105   : > { %v1869_v3 = vpop.eup %1868  ;;  %1894 = vrcp.f32 %v841_v60  ;;  %v634_v52 = vadd.f32 %v578_v34, %v357_v33  ;;  %v968_v34 = vld [vmem:[%s2287_s30 + $0x40] sm:$0xff] }
 0x106   : > { %v1871_v9 = vpop.eup %1870  ;;  %1896 = vrcp.f32 %v834_v58  ;;  %v1702_v13 = vmul.f32 -1.442695, %v635_v53  ;;  %1210 = vperm.xlu1 %1717, %v1867_v50   ;;  %v960_v58 = vld [vmem:[%s2287_s30] sm:$0xff] }
 0x107   : > { %v1873_v18 = vpop.eup %1872  ;;  %v843_v25 = vadd.f32 1.0, %v1871_v9  ;;  %1898 = vpow2.f32 %v1695_v62  ;;  %v1701_v6 = vmul.f32 -1.442695, %v634_v52  ;;  %v962_v62 = vld [vmem:[%s2287_s30 + $0x10] sm:$0xff]  ;;  %v965_v9 = vld [vmem:[%s2287_s30 + $0x28] sm:$0xff] }
 0x108   : > { %v1875_v32 = vpop.eup %1874  ;;  %1900 = vpow2.f32 %v1702_v13  ;;  %1255 = vperm.xlu0 %1716, %v1869_v3   ;;  %v838_v46 = vadd.f32 1.0, %v1873_v18  ;;  %v964_v3 = vld [vmem:[%s2287_s30 + $0x20] sm:$0xff] }
 0x109   : > { %v1877_v36 = vpop.eup %1876  ;;  %1902 = vrcp.f32 %v843_v25  ;;  %v966_v25 = vld [vmem:[%s2287_s30 + $0x30] sm:$0xff] }
 0x10a   : > { %v1879_v42 = vpop.eup %1878  ;;  %1904 = vrcp.f32 %v836_v10  ;;  %1220 = vperm.xlu1 %1717, %v1875_v32  }
 0x10b   : > { %v1881_v48 = vpop.eup %1880  ;;  %v845_v49 = vadd.f32 1.0, %v1879_v42  ;;  %1906 = vpow2.f32 %v1697_v26  ;;  %v967_v26 = vld [vmem:[%s2287_s30 + $0x38] sm:$0xff]  ;;  %v978_v42 = vld [vmem:[%s2287_s30 + $0x90] sm:$0xff] }
 0x10c   : > { %v1883_v54 = vpop.eup %1882  ;;  %1265 = vperm.xlu0 %1716, %v1877_v36   ;;  %v840_v5 = vadd.f32 1.0, %v1881_v48  ;;  %v969_v36 = vld [vmem:[%s2287_s30 + $0x48] sm:$0xff] }
 0x10d   : > { %v1885_v63 = vpop.eup %1884  ;;  %1908 = vrcp.f32 %v845_v49 }
 0x10e   : > { %v1887_v47 = vpop.eup %1886  ;;  %v847_v4 = vadd.f32 1.0, %v1885_v63  ;;  %1910 = vrcp.f32 %v838_v46  ;;  %1230 = vperm.xlu1 %1717, %v1883_v54   ;;  %v979_v46 = vld [vmem:[%s2287_s30 + $0x98] sm:$0xff] }
 0x10f   : > { %v1889_v1 = vpop.eup %1888  ;;  %1912 = vpow2.f32 %v1699_v51 }
 0x110   : > { %v1891_v7 = vpop.eup %1890  ;;  %1914 = vrcp.f32 %v847_v4  ;;  %1275 = vperm.xlu0 %1716, %v1887_v47   ;;  %v970_v47 = vld [vmem:[%s2287_s30 + $0x50] sm:$0xff]  ;;  %v971_v4 = vld [vmem:[%s2287_s30 + $0x58] sm:$0xff] }
 0x111   : > { %v1893_v8 = vpop.eup %1892  ;;  %1916 = vrcp.f32 %v840_v5  ;;  %v842_v15 = vadd.f32 1.0, %v1891_v7  ;;  %v982_v5 = vld [vmem:[%s2287_s30 + $0xb0] sm:$0xff] }
 0x112   : > { %v1895_v11 = vpop.eup %1894  ;;  %v849_v12 = vadd.f32 1.0, %v1893_v8  ;;  %1240 = vperm.xlu1 %1717, %v1889_v1   ;;  %1918 = vpow2.f32 %v1701_v6  ;;  %v983_v1 = vld [vmem:[%s2287_s30 + $0xb8] sm:$0xff] }
 0x113   : > { %v1897_v14 = vpop.eup %1896 }
 0x114   : > { %v1899_v16 = vpop.eup %1898  ;;  %1920 = vrcp.f32 %v849_v12  ;;  %1285 = vperm.xlu0 %1716, %v1895_v11  }
 0x115   : > { %v1901_v17 = vpop.eup %1900  ;;  %1922 = vrcp.f32 %v842_v15  ;;  %v844_v22 = vadd.f32 1.0, %v1899_v16  ;;  %v972_v15 = vld [vmem:[%s2287_s30 + $0x60] sm:$0xff]  ;;  %v973_v16 = vld [vmem:[%s2287_s30 + $0x68] sm:$0xff] }
 0x116   : > { %v1903_v19 = vpop.eup %1902  ;;  %v851_v20 = vadd.f32 1.0, %v1901_v17  ;;  %1250 = vperm.xlu1 %1717, %v1897_v14   ;;  %v986_v17 = vld [vmem:[%s2287_s30 + $0xd0] sm:$0xff] }
 0x117   : > { %v1905_v21 = vpop.eup %1904 }
 0x118   : > { %v1907_v23 = vpop.eup %1906  ;;  %1924 = vrcp.f32 %v851_v20  ;;  %1295 = vperm.xlu0 %1716, %v1903_v19   ;;  %v987_v19 = vld [vmem:[%s2287_s30 + $0xd8] sm:$0xff] }
 0x119   : > { %1926 = vrcp.f32 %v844_v22  ;;  %v846_v29 = vadd.f32 1.0, %v1907_v23 }
 0x11a   : > { %v1909_v24 = vpop.eup %1908  ;;  %1260 = vperm.xlu1 %1717, %v1905_v21  }
 0x11b   : > { %v1911_v28 = vpop.eup %1910  ;;  %1928 = vrcp.f32 %v846_v29  ;;  %v974_v29 = vld [vmem:[%s2287_s30 + $0x70] sm:$0xff] }
 0x11c   : > { %v1913_v30 = vpop.eup %1912  ;;  %1305 = vperm.xlu0 %1716, %v1909_v24  }
 0x11d   : > { %v1915_v31 = vpop.eup %1914  ;;  %v848_v37 = vadd.f32 1.0, %v1913_v30  ;;  %v975_v30 = vld [vmem:[%s2287_s30 + $0x78] sm:$0xff] }
 0x11e   : > { %v1917_v35 = vpop.eup %1916  ;;  %1270 = vperm.xlu1 %1717, %v1911_v28  }
 0x11f   : > { %v1919_v38 = vpop.eup %1918  ;;  %1930 = vrcp.f32 %v848_v37 }
 0x120   : > { %1315 = vperm.xlu0 %1716, %v1915_v31   ;;  %v850_v40 = vadd.f32 1.0, %v1919_v38  ;;  %v990_v31 = vld [vmem:[%s2287_s30 + $0xf0] sm:$0xff] }
 0x121   : > { %v1921_v39 = vpop.eup %1920 }
 0x122   : > { %1280 = vperm.xlu1 %1717, %v1917_v35   ;;  %v1923_v41 = vpop.eup %1922  ;;  %1932 = vrcp.f32 %v850_v40  ;;  %v991_v35 = vld [vmem:[%s2287_s30 + $0xf8] sm:$0xff] }
 0x124   : > { %1325 = vperm.xlu0 %1716, %v1921_v39  }
 0x125   : > { %v1925_v43 = vpop.eup %1924 }
 0x126   : > { %1290 = vperm.xlu1 %1717, %v1923_v41   ;;  %v1927_v44 = vpop.eup %1926 }
 0x128   : > { %1335 = vperm.xlu0 %1716, %v1925_v43   ;;  %v1929_v45 = vpop.eup %1928 }
 0x12a   : > { %1300 = vperm.xlu1 %1717, %v1927_v44   ;;  %v976_v44 = vld [vmem:[%s2287_s30 + $0x80] sm:$0xff] }
 0x12c   : > { %v1931_v55 = vpop.eup %1930 }
 0x12e   : > { %1310 = vperm.xlu1 %1717, %v1929_v45   ;;  %v977_v45 = vld [vmem:[%s2287_s30 + $0x88] sm:$0xff] }
 0x12f   : > { %v1933_v56 = vpop.eup %1932 }
 0x132   : > { %1320 = vperm.xlu1 %1717, %v1931_v55   ;;  %v994_v55 = vld [vmem:[%s2287_s30 + $0x110] sm:$0xff] }
 0x136   : > { %1330 = vperm.xlu1 %1717, %v1933_v56   ;;  %v995_v56 = vld [vmem:[%s2287_s30 + $0x118] sm:$0xff] }
 0x139   : > { %v1071_v59 = vpop.permute.xlu0 %1070 }
 0x13a   : > { %v1338_v60 = vmul.f32 %v1071_v59, %v960_v58  ;;  %v1339_v61 = vmul.f32 %v1071_v59, %v961_v57 }
 0x13c   : > { %1446 = vst [vmem:[%s2294_s7] sm:$0xff] %v1338_v60  ;;  %1448 = vst.msk [vmem:[%s2294_s7 + $0x8] sm:$0xff] %vm1447_vm1, %v1339_v61 }
 0x13d   : > { %v1076_v50 = vpop.permute.xlu1 %1075 }
 0x13e   : > { %v1340_v53 = vmul.f32 %v1076_v50, %v962_v62  ;;  %v1341_v2 = vmul.f32 %v1076_v50, %v963_v0  ;;  %v980_v0 = vld [vmem:[%s2287_s30 + $0xa0] sm:$0xff]  ;;  %v981_v50 = vld [vmem:[%s2287_s30 + $0xa8] sm:$0xff] }
 0x140   : > { %1449 = vst [vmem:[%s2294_s7 + $0x10] sm:$0xff] %v1340_v53  ;;  %1450 = vst.msk [vmem:[%s2294_s7 + $0x18] sm:$0xff] %vm1447_vm1, %v1341_v2  ;;  %v998_v53 = vld [vmem:[%s2287_s30 + $0x130] sm:$0xff]  ;;  %v999_v2 = vld [vmem:[%s2287_s30 + $0x138] sm:$0xff] }
 0x141   : > { %v1081_v10 = vpop.permute.xlu1 %1080 }
 0x142   : > { %v1342_v13 = vmul.f32 %v1081_v10, %v964_v3  ;;  %v1343_v18 = vmul.f32 %v1081_v10, %v965_v9 }
 0x144   : > { %1451 = vst [vmem:[%s2294_s7 + $0x20] sm:$0xff] %v1342_v13  ;;  %1452 = vst.msk [vmem:[%s2294_s7 + $0x28] sm:$0xff] %vm1447_vm1, %v1343_v18 }
 0x145   : > { %v1086_v27 = vpop.permute.xlu1 %1085 }
 0x146   : > { %v1344_v32 = vmul.f32 %v1086_v27, %v966_v25  ;;  %v1345_v33 = vmul.f32 %v1086_v27, %v967_v26  ;;  %v984_v26 = vld [vmem:[%s2287_s30 + $0xc0] sm:$0xff]  ;;  %v985_v27 = vld [vmem:[%s2287_s30 + $0xc8] sm:$0xff] }
 0x148   : > { %1453 = vst [vmem:[%s2294_s7 + $0x30] sm:$0xff] %v1344_v32  ;;  %1454 = vst.msk [vmem:[%s2294_s7 + $0x38] sm:$0xff] %vm1447_vm1, %v1345_v33  ;;  %v1002_v32 = vld [vmem:[%s2287_s30 + $0x150] sm:$0xff]  ;;  %v1003_v33 = vld [vmem:[%s2287_s30 + $0x158] sm:$0xff] }
 0x149   : > { %v1091_v48 = vpop.permute.xlu1 %1090 }
 0x14a   : > { %v1346_v49 = vmul.f32 %v1091_v48, %v968_v34  ;;  %v1347_v51 = vmul.f32 %v1091_v48, %v969_v36 }
 0x14b   : > { %v1116_v52 = vpop.permute.xlu0 %1115 }
 0x14c   : > { %v1356_v54 = vmul.f32 %v1116_v52, %v978_v42  ;;  %v1357_v63 = vmul.f32 %v1116_v52, %v979_v46  ;;  %1455 = vst [vmem:[%s2294_s7 + $0x40] sm:$0xff] %v1346_v49  ;;  %1456 = vst.msk [vmem:[%s2294_s7 + $0x48] sm:$0xff] %vm1447_vm1, %v1347_v51  ;;  %v988_v51 = vld [vmem:[%s2287_s30 + $0xe0] sm:$0xff]  ;;  %v989_v52 = vld [vmem:[%s2287_s30 + $0xe8] sm:$0xff] }
 0x14d   : > { %v1096_v6 = vpop.permute.xlu1 %1095 }
 0x14e   : > { %1465 = vst [vmem:[%s2294_s7 + $0x90] sm:$0xff] %v1356_v54  ;;  %1466 = vst.msk [vmem:[%s2294_s7 + $0x98] sm:$0xff] %vm1447_vm1, %v1357_v63  ;;  %v1348_v7 = vmul.f32 %v1096_v6, %v970_v47  ;;  %v1349_v8 = vmul.f32 %v1096_v6, %v971_v4  ;;  %v1006_v54 = vld [vmem:[%s2287_s30 + $0x170] sm:$0xff]  ;;  %v1007_v63 = vld [vmem:[%s2287_s30 + $0x178] sm:$0xff] }
 0x14f   : > { %v1126_v11 = vpop.permute.xlu0 %1125 }
 0x150   : > { %v1360_v12 = vmul.f32 %v1126_v11, %v982_v5  ;;  %v1361_v14 = vmul.f32 %v1126_v11, %v983_v1  ;;  %1457 = vst [vmem:[%s2294_s7 + $0x50] sm:$0xff] %v1348_v7  ;;  %1458 = vst.msk [vmem:[%s2294_s7 + $0x58] sm:$0xff] %vm1447_vm1, %v1349_v8  ;;  %v992_v8 = vld [vmem:[%s2287_s30 + $0x100] sm:$0xff]  ;;  %v993_v11 = vld [vmem:[%s2287_s30 + $0x108] sm:$0xff] }
 0x151   : > { %v1101_v20 = vpop.permute.xlu1 %1100 }
 0x152   : > { %1469 = vst [vmem:[%s2294_s7 + $0xb0] sm:$0xff] %v1360_v12  ;;  %1470 = vst.msk [vmem:[%s2294_s7 + $0xb8] sm:$0xff] %vm1447_vm1, %v1361_v14  ;;  %v1350_v21 = vmul.f32 %v1101_v20, %v972_v15  ;;  %v1351_v22 = vmul.f32 %v1101_v20, %v973_v16  ;;  %v1010_v12 = vld [vmem:[%s2287_s30 + $0x190] sm:$0xff]  ;;  %v1011_v14 = vld [vmem:[%s2287_s30 + $0x198] sm:$0xff] }
 0x153   : > { %v1136_v23 = vpop.permute.xlu0 %1135 }
 0x154   : > { %v1364_v24 = vmul.f32 %v1136_v23, %v986_v17  ;;  %v1365_v28 = vmul.f32 %v1136_v23, %v987_v19  ;;  %1459 = vst [vmem:[%s2294_s7 + $0x60] sm:$0xff] %v1350_v21  ;;  %1460 = vst.msk [vmem:[%s2294_s7 + $0x68] sm:$0xff] %vm1447_vm1, %v1351_v22  ;;  %v996_v22 = vld [vmem:[%s2287_s30 + $0x120] sm:$0xff]  ;;  %v997_v23 = vld [vmem:[%s2287_s30 + $0x128] sm:$0xff] }
 0x155   : > { %v1106_v37 = vpop.permute.xlu1 %1105 }
 0x156   : > { %1473 = vst [vmem:[%s2294_s7 + $0xd0] sm:$0xff] %v1364_v24  ;;  %1474 = vst.msk [vmem:[%s2294_s7 + $0xd8] sm:$0xff] %vm1447_vm1, %v1365_v28  ;;  %v1352_v38 = vmul.f32 %v1106_v37, %v974_v29  ;;  %v1353_v39 = vmul.f32 %v1106_v37, %v975_v30  ;;  %v1014_v24 = vld [vmem:[%s2287_s30 + $0x1b0] sm:$0xff]  ;;  %v1015_v28 = vld [vmem:[%s2287_s30 + $0x1b8] sm:$0xff] }
 0x157   : > { %v1146_v40 = vpop.permute.xlu0 %1145 }
 0x158   : > { %v1368_v41 = vmul.f32 %v1146_v40, %v990_v31  ;;  %v1369_v43 = vmul.f32 %v1146_v40, %v991_v35  ;;  %1461 = vst [vmem:[%s2294_s7 + $0x70] sm:$0xff] %v1352_v38  ;;  %1462 = vst.msk [vmem:[%s2294_s7 + $0x78] sm:$0xff] %vm1447_vm1, %v1353_v39  ;;  %v1000_v39 = vld [vmem:[%s2287_s30 + $0x140] sm:$0xff]  ;;  %v1001_v40 = vld [vmem:[%s2287_s30 + $0x148] sm:$0xff] }
 0x159   : > { %v1111_v58 = vpop.permute.xlu1 %1110 }
 0x15a   : > { %1477 = vst [vmem:[%s2294_s7 + $0xf0] sm:$0xff] %v1368_v41  ;;  %1478 = vst.msk [vmem:[%s2294_s7 + $0xf8] sm:$0xff] %vm1447_vm1, %v1369_v43  ;;  %v1354_v57 = vmul.f32 %v1111_v58, %v976_v44  ;;  %v1355_v59 = vmul.f32 %v1111_v58, %v977_v45  ;;  %v1018_v41 = vld [vmem:[%s2287_s30 + $0x1d0] sm:$0xff]  ;;  %v1019_v43 = vld [vmem:[%s2287_s30 + $0x1d8] sm:$0xff] }
 0x15b   : > { %v1156_v60 = vpop.permute.xlu0 %1155 }
 0x15c   : > { %v1372_v61 = vmul.f32 %v1156_v60, %v994_v55  ;;  %v1373_v62 = vmul.f32 %v1156_v60, %v995_v56  ;;  %1463 = vst [vmem:[%s2294_s7 + $0x80] sm:$0xff] %v1354_v57  ;;  %1464 = vst.msk [vmem:[%s2294_s7 + $0x88] sm:$0xff] %vm1447_vm1, %v1355_v59  ;;  %v1004_v59 = vld [vmem:[%s2287_s30 + $0x160] sm:$0xff]  ;;  %v1005_v60 = vld [vmem:[%s2287_s30 + $0x168] sm:$0xff] }
 0x15d   : > { %v1121_v3 = vpop.permute.xlu1 %1120 }
 0x15e   : > { %1481 = vst [vmem:[%s2294_s7 + $0x110] sm:$0xff] %v1372_v61  ;;  %1482 = vst.msk [vmem:[%s2294_s7 + $0x118] sm:$0xff] %vm1447_vm1, %v1373_v62  ;;  %v1358_v9 = vmul.f32 %v1121_v3, %v980_v0  ;;  %v1359_v10 = vmul.f32 %v1121_v3, %v981_v50  ;;  %v1022_v61 = vld [vmem:[%s2287_s30 + $0x1f0] sm:$0xff]  ;;  %v1023_v62 = vld [vmem:[%s2287_s30 + $0x1f8] sm:$0xff] }
 0x15f   : > { %v1166_v13 = vpop.permute.xlu0 %1165 }
 0x160   : > { %v1376_v18 = vmul.f32 %v1166_v13, %v998_v53  ;;  %v1377_v25 = vmul.f32 %v1166_v13, %v999_v2  ;;  %1467 = vst [vmem:[%s2294_s7 + $0xa0] sm:$0xff] %v1358_v9  ;;  %1468 = vst.msk [vmem:[%s2294_s7 + $0xa8] sm:$0xff] %vm1447_vm1, %v1359_v10  ;;  %v1008_v10 = vld [vmem:[%s2287_s30 + $0x180] sm:$0xff]  ;;  %v1009_v13 = vld [vmem:[%s2287_s30 + $0x188] sm:$0xff] }
 0x161   : > { %v1131_v34 = vpop.permute.xlu1 %1130 }
 0x162   : > { %1485 = vst [vmem:[%s2294_s7 + $0x130] sm:$0xff] %v1376_v18  ;;  %1486 = vst.msk [vmem:[%s2294_s7 + $0x138] sm:$0xff] %vm1447_vm1, %v1377_v25  ;;  %v1362_v36 = vmul.f32 %v1131_v34, %v984_v26  ;;  %v1363_v42 = vmul.f32 %v1131_v34, %v985_v27  ;;  %v1026_v18 = vld [vmem:[%s2287_s30 + $0x210] sm:$0xff]  ;;  %v1027_v25 = vld [vmem:[%s2287_s30 + $0x218] sm:$0xff] }
 0x163   : > { %v1176_v46 = vpop.permute.xlu0 %1175 }
 0x164   : > { %v1380_v48 = vmul.f32 %v1176_v46, %v1002_v32  ;;  %v1381_v49 = vmul.f32 %v1176_v46, %v1003_v33  ;;  %1471 = vst [vmem:[%s2294_s7 + $0xc0] sm:$0xff] %v1362_v36  ;;  %1472 = vst.msk [vmem:[%s2294_s7 + $0xc8] sm:$0xff] %vm1447_vm1, %v1363_v42  ;;  %v1012_v42 = vld [vmem:[%s2287_s30 + $0x1a0] sm:$0xff]  ;;  %v1013_v46 = vld [vmem:[%s2287_s30 + $0x1a8] sm:$0xff] }
 0x165   : > { %v1141_v47 = vpop.permute.xlu1 %1140 }
 0x166   : > { %1489 = vst [vmem:[%s2294_s7 + $0x150] sm:$0xff] %v1380_v48  ;;  %1490 = vst.msk [vmem:[%s2294_s7 + $0x158] sm:$0xff] %vm1447_vm1, %v1381_v49  ;;  %v1366_v4 = vmul.f32 %v1141_v47, %v988_v51  ;;  %v1367_v5 = vmul.f32 %v1141_v47, %v989_v52  ;;  %v1030_v48 = vld [vmem:[%s2287_s30 + $0x230] sm:$0xff]  ;;  %v1031_v49 = vld [vmem:[%s2287_s30 + $0x238] sm:$0xff] }
 0x167   : > { %v1186_v1 = vpop.permute.xlu0 %1185 }
 0x168   : > { %v1384_v6 = vmul.f32 %v1186_v1, %v1006_v54  ;;  %v1385_v7 = vmul.f32 %v1186_v1, %v1007_v63  ;;  %1475 = vst [vmem:[%s2294_s7 + $0xe0] sm:$0xff] %v1366_v4  ;;  %1476 = vst.msk [vmem:[%s2294_s7 + $0xe8] sm:$0xff] %vm1447_vm1, %v1367_v5  ;;  %v1016_v5 = vld [vmem:[%s2287_s30 + $0x1c0] sm:$0xff]  ;;  %v1017_v1 = vld [vmem:[%s2287_s30 + $0x1c8] sm:$0xff] }
 0x169   : > { %v1151_v15 = vpop.permute.xlu1 %1150 }
 0x16a   : > { %1493 = vst [vmem:[%s2294_s7 + $0x170] sm:$0xff] %v1384_v6  ;;  %1494 = vst.msk [vmem:[%s2294_s7 + $0x178] sm:$0xff] %vm1447_vm1, %v1385_v7  ;;  %v1370_v16 = vmul.f32 %v1151_v15, %v992_v8  ;;  %v1371_v17 = vmul.f32 %v1151_v15, %v993_v11  ;;  %v1034_v6 = vld [vmem:[%s2287_s30 + $0x250] sm:$0xff]  ;;  %v1035_v7 = vld [vmem:[%s2287_s30 + $0x258] sm:$0xff] }
 0x16b   : > { %v1196_v19 = vpop.permute.xlu0 %1195 }
 0x16c   : > { %v1388_v20 = vmul.f32 %v1196_v19, %v1010_v12  ;;  %v1389_v21 = vmul.f32 %v1196_v19, %v1011_v14  ;;  %1479 = vst [vmem:[%s2294_s7 + $0x100] sm:$0xff] %v1370_v16  ;;  %1480 = vst.msk [vmem:[%s2294_s7 + $0x108] sm:$0xff] %vm1447_vm1, %v1371_v17  ;;  %v1020_v17 = vld [vmem:[%s2287_s30 + $0x1e0] sm:$0xff]  ;;  %v1021_v19 = vld [vmem:[%s2287_s30 + $0x1e8] sm:$0xff] }
 0x16d   : > { %v1161_v29 = vpop.permute.xlu1 %1160 }
 0x16e   : > { %1497 = vst [vmem:[%s2294_s7 + $0x190] sm:$0xff] %v1388_v20  ;;  %1498 = vst.msk [vmem:[%s2294_s7 + $0x198] sm:$0xff] %vm1447_vm1, %v1389_v21  ;;  %v1374_v30 = vmul.f32 %v1161_v29, %v996_v22  ;;  %v1375_v31 = vmul.f32 %v1161_v29, %v997_v23  ;;  %v1038_v20 = vld [vmem:[%s2287_s30 + $0x270] sm:$0xff]  ;;  %v1039_v21 = vld [vmem:[%s2287_s30 + $0x278] sm:$0xff] }
 0x16f   : > { %v1206_v35 = vpop.permute.xlu0 %1205 }
 0x170   : > { %v1392_v37 = vmul.f32 %v1206_v35, %v1014_v24  ;;  %v1393_v38 = vmul.f32 %v1206_v35, %v1015_v28  ;;  %1483 = vst [vmem:[%s2294_s7 + $0x120] sm:$0xff] %v1374_v30  ;;  %1484 = vst.msk [vmem:[%s2294_s7 + $0x128] sm:$0xff] %vm1447_vm1, %v1375_v31  ;;  %v1024_v31 = vld [vmem:[%s2287_s30 + $0x200] sm:$0xff]  ;;  %v1025_v35 = vld [vmem:[%s2287_s30 + $0x208] sm:$0xff] }
 0x171   : > { %v1171_v44 = vpop.permute.xlu1 %1170 }
 0x172   : > { %1501 = vst [vmem:[%s2294_s7 + $0x1b0] sm:$0xff] %v1392_v37  ;;  %1502 = vst.msk [vmem:[%s2294_s7 + $0x1b8] sm:$0xff] %vm1447_vm1, %v1393_v38  ;;  %v1378_v45 = vmul.f32 %v1171_v44, %v1000_v39  ;;  %v1379_v55 = vmul.f32 %v1171_v44, %v1001_v40  ;;  %v1042_v37 = vld [vmem:[%s2287_s30 + $0x290] sm:$0xff]  ;;  %v1043_v38 = vld [vmem:[%s2287_s30 + $0x298] sm:$0xff] }
 0x173   : > { %v1216_v56 = vpop.permute.xlu0 %1215 }
 0x174   : > { %v1396_v58 = vmul.f32 %v1216_v56, %v1018_v41  ;;  %v1397_v57 = vmul.f32 %v1216_v56, %v1019_v43  ;;  %1487 = vst [vmem:[%s2294_s7 + $0x140] sm:$0xff] %v1378_v45  ;;  %1488 = vst.msk [vmem:[%s2294_s7 + $0x148] sm:$0xff] %vm1447_vm1, %v1379_v55  ;;  %v1028_v55 = vld [vmem:[%s2287_s30 + $0x220] sm:$0xff]  ;;  %v1029_v56 = vld [vmem:[%s2287_s30 + $0x228] sm:$0xff] }
 0x175   : > { %v1181_v0 = vpop.permute.xlu1 %1180 }
 0x176   : > { %1505 = vst [vmem:[%s2294_s7 + $0x1d0] sm:$0xff] %v1396_v58  ;;  %1506 = vst.msk [vmem:[%s2294_s7 + $0x1d8] sm:$0xff] %vm1447_vm1, %v1397_v57  ;;  %v1382_v50 = vmul.f32 %v1181_v0, %v1004_v59  ;;  %v1383_v53 = vmul.f32 %v1181_v0, %v1005_v60  ;;  %v1046_v58 = vld [vmem:[%s2287_s30 + $0x2b0] sm:$0xff]  ;;  %v1047_v57 = vld [vmem:[%s2287_s30 + $0x2b8] sm:$0xff] }
 0x177   : > { %v1226_v2 = vpop.permute.xlu0 %1225 }
 0x178   : > { %v1400_v3 = vmul.f32 %v1226_v2, %v1022_v61  ;;  %v1401_v9 = vmul.f32 %v1226_v2, %v1023_v62  ;;  %1491 = vst [vmem:[%s2294_s7 + $0x160] sm:$0xff] %v1382_v50  ;;  %1492 = vst.msk [vmem:[%s2294_s7 + $0x168] sm:$0xff] %vm1447_vm1, %v1383_v53  ;;  %v1032_v53 = vld [vmem:[%s2287_s30 + $0x240] sm:$0xff]  ;;  %v1033_v2 = vld [vmem:[%s2287_s30 + $0x248] sm:$0xff] }
 0x179   : > { %v1191_v26 = vpop.permute.xlu1 %1190 }
 0x17a   : > { %1509 = vst [vmem:[%s2294_s7 + $0x1f0] sm:$0xff] %v1400_v3  ;;  %1510 = vst.msk [vmem:[%s2294_s7 + $0x1f8] sm:$0xff] %vm1447_vm1, %v1401_v9  ;;  %v1386_v27 = vmul.f32 %v1191_v26, %v1008_v10  ;;  %v1387_v32 = vmul.f32 %v1191_v26, %v1009_v13  ;;  %v1050_v3 = vld [vmem:[%s2287_s30 + $0x2d0] sm:$0xff]  ;;  %v1051_v9 = vld [vmem:[%s2287_s30 + $0x2d8] sm:$0xff] }
 0x17b   : > { %v1236_v33 = vpop.permute.xlu0 %1235 }
 0x17c   : > { %v1404_v34 = vmul.f32 %v1236_v33, %v1026_v18  ;;  %v1405_v36 = vmul.f32 %v1236_v33, %v1027_v25  ;;  %1495 = vst [vmem:[%s2294_s7 + $0x180] sm:$0xff] %v1386_v27  ;;  %1496 = vst.msk [vmem:[%s2294_s7 + $0x188] sm:$0xff] %vm1447_vm1, %v1387_v32  ;;  %v1036_v32 = vld [vmem:[%s2287_s30 + $0x260] sm:$0xff]  ;;  %v1037_v33 = vld [vmem:[%s2287_s30 + $0x268] sm:$0xff] }
 0x17d   : > { %v1201_v51 = vpop.permute.xlu1 %1200 }
 0x17e   : > { %1513 = vst [vmem:[%s2294_s7 + $0x210] sm:$0xff] %v1404_v34  ;;  %1514 = vst.msk [vmem:[%s2294_s7 + $0x218] sm:$0xff] %vm1447_vm1, %v1405_v36  ;;  %v1390_v52 = vmul.f32 %v1201_v51, %v1012_v42  ;;  %v1391_v54 = vmul.f32 %v1201_v51, %v1013_v46  ;;  %v1054_v34 = vld [vmem:[%s2287_s30 + $0x2f0] sm:$0xff]  ;;  %v1055_v36 = vld [vmem:[%s2287_s30 + $0x2f8] sm:$0xff] }
 0x17f   : > { %v1246_v63 = vpop.permute.xlu0 %1245 }
 0x180   : > { %v1408_v47 = vmul.f32 %v1246_v63, %v1030_v48  ;;  %v1409_v4 = vmul.f32 %v1246_v63, %v1031_v49  ;;  %1499 = vst [vmem:[%s2294_s7 + $0x1a0] sm:$0xff] %v1390_v52  ;;  %1500 = vst.msk [vmem:[%s2294_s7 + $0x1a8] sm:$0xff] %vm1447_vm1, %v1391_v54  ;;  %v1040_v54 = vld [vmem:[%s2287_s30 + $0x280] sm:$0xff]  ;;  %v1041_v63 = vld [vmem:[%s2287_s30 + $0x288] sm:$0xff] }
 0x181   : > { %v1211_v8 = vpop.permute.xlu1 %1210 }
 0x182   : > { %1517 = vst [vmem:[%s2294_s7 + $0x230] sm:$0xff] %v1408_v47  ;;  %1518 = vst.msk [vmem:[%s2294_s7 + $0x238] sm:$0xff] %vm1447_vm1, %v1409_v4  ;;  %v1394_v11 = vmul.f32 %v1211_v8, %v1016_v5  ;;  %v1395_v12 = vmul.f32 %v1211_v8, %v1017_v1  ;;  %v1058_v47 = vld [vmem:[%s2287_s30 + $0x310] sm:$0xff]  ;;  %v1059_v4 = vld [vmem:[%s2287_s30 + $0x318] sm:$0xff] }
 0x183   : > { %v1256_v14 = vpop.permute.xlu0 %1255 }
 0x184   : > { %v1412_v15 = vmul.f32 %v1256_v14, %v1034_v6  ;;  %v1413_v16 = vmul.f32 %v1256_v14, %v1035_v7  ;;  %1503 = vst [vmem:[%s2294_s7 + $0x1c0] sm:$0xff] %v1394_v11  ;;  %1504 = vst.msk [vmem:[%s2294_s7 + $0x1c8] sm:$0xff] %vm1447_vm1, %v1395_v12  ;;  %v1044_v12 = vld [vmem:[%s2287_s30 + $0x2a0] sm:$0xff]  ;;  %v1045_v14 = vld [vmem:[%s2287_s30 + $0x2a8] sm:$0xff] }
 0x185   : > { %v1221_v22 = vpop.permute.xlu1 %1220 }
 0x186   : > { %1521 = vst [vmem:[%s2294_s7 + $0x250] sm:$0xff] %v1412_v15  ;;  %1522 = vst.msk [vmem:[%s2294_s7 + $0x258] sm:$0xff] %vm1447_vm1, %v1413_v16  ;;  %v1398_v23 = vmul.f32 %v1221_v22, %v1020_v17  ;;  %v1399_v24 = vmul.f32 %v1221_v22, %v1021_v19  ;;  %v1062_v15 = vld [vmem:[%s2287_s30 + $0x330] sm:$0xff]  ;;  %v1063_v16 = vld [vmem:[%s2287_s30 + $0x338] sm:$0xff] }
 0x187   : > { %v1266_v28 = vpop.permute.xlu0 %1265 }
 0x188   : > { %v1416_v29 = vmul.f32 %v1266_v28, %v1038_v20  ;;  %v1417_v30 = vmul.f32 %v1266_v28, %v1039_v21  ;;  %1507 = vst [vmem:[%s2294_s7 + $0x1e0] sm:$0xff] %v1398_v23  ;;  %1508 = vst.msk [vmem:[%s2294_s7 + $0x1e8] sm:$0xff] %vm1447_vm1, %v1399_v24  ;;  %v1048_v24 = vld [vmem:[%s2287_s30 + $0x2c0] sm:$0xff]  ;;  %v1049_v28 = vld [vmem:[%s2287_s30 + $0x2c8] sm:$0xff] }
 0x189   : > { %v1231_v39 = vpop.permute.xlu1 %1230 }
 0x18a   : > { %1525 = vst [vmem:[%s2294_s7 + $0x270] sm:$0xff] %v1416_v29  ;;  %1526 = vst.msk [vmem:[%s2294_s7 + $0x278] sm:$0xff] %vm1447_vm1, %v1417_v30  ;;  %v1402_v40 = vmul.f32 %v1231_v39, %v1024_v31  ;;  %v1403_v41 = vmul.f32 %v1231_v39, %v1025_v35  ;;  %v1066_v29 = vld [vmem:[%s2287_s30 + $0x350] sm:$0xff]  ;;  %v1067_v30 = vld [vmem:[%s2287_s30 + $0x358] sm:$0xff] }
 0x18b   : > { %v1276_v43 = vpop.permute.xlu0 %1275 }
 0x18c   : > { %v1420_v44 = vmul.f32 %v1276_v43, %v1042_v37  ;;  %v1421_v45 = vmul.f32 %v1276_v43, %v1043_v38  ;;  %1511 = vst [vmem:[%s2294_s7 + $0x200] sm:$0xff] %v1402_v40  ;;  %1512 = vst.msk [vmem:[%s2294_s7 + $0x208] sm:$0xff] %vm1447_vm1, %v1403_v41  ;;  %v1052_v41 = vld [vmem:[%s2287_s30 + $0x2e0] sm:$0xff]  ;;  %v1053_v43 = vld [vmem:[%s2287_s30 + $0x2e8] sm:$0xff] }
 0x18d   : > { %v1241_v59 = vpop.permute.xlu1 %1240 }
 0x18e   : > { %1529 = vst [vmem:[%s2294_s7 + $0x290] sm:$0xff] %v1420_v44  ;;  %1530 = vst.msk [vmem:[%s2294_s7 + $0x298] sm:$0xff] %vm1447_vm1, %v1421_v45  ;;  %v1406_v60 = vmul.f32 %v1241_v59, %v1028_v55  ;;  %v1407_v61 = vmul.f32 %v1241_v59, %v1029_v56  ;;  %v1056_v56 = vld [vmem:[%s2287_s30 + $0x300] sm:$0xff] }
 0x18f   : > { %v1286_v62 = vpop.permute.xlu0 %1285 }
 0x190   : > { %v1424_v0 = vmul.f32 %v1286_v62, %v1046_v58  ;;  %v1425_v50 = vmul.f32 %v1286_v62, %v1047_v57  ;;  %1515 = vst [vmem:[%s2294_s7 + $0x220] sm:$0xff] %v1406_v60  ;;  %1516 = vst.msk [vmem:[%s2294_s7 + $0x228] sm:$0xff] %vm1447_vm1, %v1407_v61  ;;  %v1057_v58 = vld [vmem:[%s2287_s30 + $0x308] sm:$0xff]  ;;  %v1060_v61 = vld [vmem:[%s2287_s30 + $0x320] sm:$0xff] }
 0x191   : > { %v1251_v10 = vpop.permute.xlu1 %1250  ;;  %v1061_v62 = vld [vmem:[%s2287_s30 + $0x328] sm:$0xff] }
 0x192   : > { %1533 = vst [vmem:[%s2294_s7 + $0x2b0] sm:$0xff] %v1424_v0  ;;  %1534 = vst.msk [vmem:[%s2294_s7 + $0x2b8] sm:$0xff] %vm1447_vm1, %v1425_v50  ;;  %v1410_v13 = vmul.f32 %v1251_v10, %v1032_v53  ;;  %v1411_v18 = vmul.f32 %v1251_v10, %v1033_v2  ;;  %v1064_v2 = vld [vmem:[%s2287_s30 + $0x340] sm:$0xff] }
 0x193   : > { %v1296_v25 = vpop.permute.xlu0 %1295 }
 0x194   : > { %v1428_v26 = vmul.f32 %v1296_v25, %v1050_v3  ;;  %v1429_v27 = vmul.f32 %v1296_v25, %v1051_v9  ;;  %1519 = vst [vmem:[%s2294_s7 + $0x240] sm:$0xff] %v1410_v13  ;;  %1520 = vst.msk [vmem:[%s2294_s7 + $0x248] sm:$0xff] %vm1447_vm1, %v1411_v18  ;;  %v1065_v3 = vld [vmem:[%s2287_s30 + $0x348] sm:$0xff] }
 0x195   : > { %v1261_v42 = vpop.permute.xlu1 %1260 }
 0x196   : > { %1537 = vst [vmem:[%s2294_s7 + $0x2d0] sm:$0xff] %v1428_v26  ;;  %1538 = vst.msk [vmem:[%s2294_s7 + $0x2d8] sm:$0xff] %vm1447_vm1, %v1429_v27  ;;  %v1414_v46 = vmul.f32 %v1261_v42, %v1036_v32  ;;  %v1415_v48 = vmul.f32 %v1261_v42, %v1037_v33 }
 0x197   : > { %v1306_v49 = vpop.permute.xlu0 %1305 }
 0x198   : > { %v1432_v51 = vmul.f32 %v1306_v49, %v1054_v34  ;;  %v1433_v52 = vmul.f32 %v1306_v49, %v1055_v36  ;;  %1523 = vst [vmem:[%s2294_s7 + $0x260] sm:$0xff] %v1414_v46  ;;  %1524 = vst.msk [vmem:[%s2294_s7 + $0x268] sm:$0xff] %vm1447_vm1, %v1415_v48 }
 0x199   : > { %v1271_v5 = vpop.permute.xlu1 %1270 }
 0x19a   : > { %1541 = vst [vmem:[%s2294_s7 + $0x2f0] sm:$0xff] %v1432_v51  ;;  %1542 = vst.msk [vmem:[%s2294_s7 + $0x2f8] sm:$0xff] %vm1447_vm1, %v1433_v52  ;;  %v1418_v1 = vmul.f32 %v1271_v5, %v1040_v54  ;;  %v1419_v6 = vmul.f32 %v1271_v5, %v1041_v63 }
 0x19b   : > { %v1316_v7 = vpop.permute.xlu0 %1315 }
 0x19c   : > { %v1436_v8 = vmul.f32 %v1316_v7, %v1058_v47  ;;  %v1437_v11 = vmul.f32 %v1316_v7, %v1059_v4  ;;  %1527 = vst [vmem:[%s2294_s7 + $0x280] sm:$0xff] %v1418_v1  ;;  %1528 = vst.msk [vmem:[%s2294_s7 + $0x288] sm:$0xff] %vm1447_vm1, %v1419_v6 }
 0x19d   : > { %v1281_v17 = vpop.permute.xlu1 %1280 }
 0x19e   : > { %1545 = vst [vmem:[%s2294_s7 + $0x310] sm:$0xff] %v1436_v8  ;;  %1546 = vst.msk [vmem:[%s2294_s7 + $0x318] sm:$0xff] %vm1447_vm1, %v1437_v11  ;;  %v1422_v19 = vmul.f32 %v1281_v17, %v1044_v12  ;;  %v1423_v20 = vmul.f32 %v1281_v17, %v1045_v14 }
 0x19f   : > { %v1326_v21 = vpop.permute.xlu0 %1325 }
 0x1a0   : > { %v1440_v22 = vmul.f32 %v1326_v21, %v1062_v15  ;;  %v1441_v23 = vmul.f32 %v1326_v21, %v1063_v16  ;;  %1531 = vst [vmem:[%s2294_s7 + $0x2a0] sm:$0xff] %v1422_v19  ;;  %1532 = vst.msk [vmem:[%s2294_s7 + $0x2a8] sm:$0xff] %vm1447_vm1, %v1423_v20 }
 0x1a1   : > { %v1291_v31 = vpop.permute.xlu1 %1290 }
 0x1a2   : > { %1549 = vst [vmem:[%s2294_s7 + $0x330] sm:$0xff] %v1440_v22  ;;  %1550 = vst.msk [vmem:[%s2294_s7 + $0x338] sm:$0xff] %vm1447_vm1, %v1441_v23  ;;  %v1426_v35 = vmul.f32 %v1291_v31, %v1048_v24  ;;  %v1427_v37 = vmul.f32 %v1291_v31, %v1049_v28 }
 0x1a3   : > { %v1336_v38 = vpop.permute.xlu0 %1335 }
 0x1a4   : > { %v1444_v39 = vmul.f32 %v1336_v38, %v1066_v29  ;;  %v1445_v40 = vmul.f32 %v1336_v38, %v1067_v30  ;;  %1535 = vst [vmem:[%s2294_s7 + $0x2c0] sm:$0xff] %v1426_v35  ;;  %1536 = vst.msk [vmem:[%s2294_s7 + $0x2c8] sm:$0xff] %vm1447_vm1, %v1427_v37 }
 0x1a5   : > { %v1301_v44 = vpop.permute.xlu1 %1300 }
 0x1a6   : > { %1553 = vst [vmem:[%s2294_s7 + $0x350] sm:$0xff] %v1444_v39  ;;  %1554 = vst.msk [vmem:[%s2294_s7 + $0x358] sm:$0xff] %vm1447_vm1, %v1445_v40  ;;  %v1430_v45 = vmul.f32 %v1301_v44, %v1052_v41  ;;  %v1431_v55 = vmul.f32 %v1301_v44, %v1053_v43 }
 0x1a8   : > { %1539 = vst [vmem:[%s2294_s7 + $0x2e0] sm:$0xff] %v1430_v45  ;;  %1540 = vst.msk [vmem:[%s2294_s7 + $0x2e8] sm:$0xff] %vm1447_vm1, %v1431_v55 }
 0x1a9   : > { %v1311_v57 = vpop.permute.xlu1 %1310 }
 0x1aa   : > { %v1434_v59 = vmul.f32 %v1311_v57, %v1056_v56  ;;  %v1435_v60 = vmul.f32 %v1311_v57, %v1057_v58 }
 0x1ac   : > { %1543 = vst [vmem:[%s2294_s7 + $0x300] sm:$0xff] %v1434_v59  ;;  %1544 = vst.msk [vmem:[%s2294_s7 + $0x308] sm:$0xff] %vm1447_vm1, %v1435_v60 }
 0x1ad   : > { %v1321_v0 = vpop.permute.xlu1 %1320 }
 0x1ae   : > { %v1438_v50 = vmul.f32 %v1321_v0, %v1060_v61  ;;  %v1439_v53 = vmul.f32 %v1321_v0, %v1061_v62 }
 0x1b0   : > { %1547 = vst [vmem:[%s2294_s7 + $0x320] sm:$0xff] %v1438_v50  ;;  %1548 = vst.msk [vmem:[%s2294_s7 + $0x328] sm:$0xff] %vm1447_vm1, %v1439_v53 }
 0x1b1   : > { %v1331_v9 = vpop.permute.xlu1 %1330 }
 0x1b2   : > { %v1442_v10 = vmul.f32 %v1331_v9, %v1064_v2  ;;  %v1443_v13 = vmul.f32 %v1331_v9, %v1065_v3 }
 0x1b4   : > { %1551 = vst [vmem:[%s2294_s7 + $0x340] sm:$0xff] %v1442_v10  ;;  %1552 = vst.msk [vmem:[%s2294_s7 + $0x348] sm:$0xff] %vm1447_vm1, %v1443_v13 }
 0x1b5 PF: > { %s14_s15 = sadd.s32 1, %s1940_s15  }
 0x1b6   : > { %p11_p4 = scmp.ge.s32.totalorder %s14_s15, 4  }
 0x1b8   :  { %13 = sbr.rel (!%p11_p4) target bundleno = 1 (0x1), region = 72 }

</bundles_post_ra>
